<compile_context>
chip_gen: v6e
topology: v6e:2x2x1
jax: 0.10.0
libtpu: 0.0.40
codegen_flags: <defaults>
</compile_context>

<pallas_src>
import functools

import jax
import jax.numpy as jnp
from jax.experimental import pallas as pl
from jax.experimental.pallas import tpu as pltpu

# 784 -> 512 -> 384 -> 256 -> 200 -> 128 -> 64 -> 32 -> 10, ReLU after all but last.
LAYER_DIMS = [28 * 28, 512, 384, 256, 200, 128, 64, 32, 10]
N_LAYERS = len(LAYER_DIMS) - 1


def _round_up(x, m):
    return (x + m - 1) // m * m


# Lane-pad hidden/output feature dims to multiples of 128 (200->256, 64/32/10->128).
PAD_DIMS = [LAYER_DIMS[0]] + [_round_up(d, 128) for d in LAYER_DIMS[1:]]
OUT_PAD = PAD_DIMS[-1]          # 128
BIAS_PAD = max(PAD_DIMS[1:])    # 512: all biases share one stacked [8, 512] array

# Tail layers whose padded weight is exactly 128x128 get stacked into one [k,128,128].
_SMALL = [i for i in range(N_LAYERS) if PAD_DIMS[i] == 128 and PAD_DIMS[i + 1] == 128]
N_BIG = _SMALL[0]
assert _SMALL == list(range(N_BIG, N_LAYERS))

_MAX_TILE_B = 1024  # batch-tile cap (was 256): amortizes the ~0.35us/step pipeline floor


def _tensorcores_per_chip():
    """Best-effort detection of 2-TensorCore chips (v4 / v5p / v7x); safe fallback 1."""
    try:
        kind = jax.devices()[0].device_kind.lower()
    except Exception:
        return 1
    if any(tag in kind for tag in ("v4", "v5p", "v7", "7x")):
        return 2
    return 1


_NUM_TC = _tensorcores_per_chip()


def _choose_grid(batch):
    """Pick (tile_b, n_tiles): balanced tiles, <=1024 rows, >=2 tiles on 2-TC chips."""
    n_tiles = max(1, pl.cdiv(batch, _MAX_TILE_B))
    if _NUM_TC > 1 and batch >= 32:
        # Shard the "parallel" batch axis across both TensorCores (even tile count).
        n_tiles = _round_up(max(n_tiles, _NUM_TC), _NUM_TC)
    tile_b = _round_up(pl.cdiv(batch, n_tiles), 8)
    return tile_b, n_tiles


@functools.lru_cache(maxsize=None)
def _single_buffer_supported():
    """Probe whether pipeline_mode=pl.Buffered(1) is accepted by this jax/libtpu."""
    try:
        def copy_kernel(x_ref, o_ref):
            o_ref[...] = x_ref[...]

        fn = pl.pallas_call(
            copy_kernel,
            out_shape=jax.ShapeDtypeStruct((8, 128), jnp.float32),
            grid=(1,),
            in_specs=[pl.BlockSpec((8, 128), lambda i: (0, 0),
                                   pipeline_mode=pl.Buffered(1))],
            out_specs=pl.BlockSpec((8, 128), lambda i: (0, 0)),
        )
        jax.jit(fn).lower(jax.ShapeDtypeStruct((8, 128), jnp.float32)).compile()
        return True
    except Exception:
        return False


def mlp_kernel(x_ref, w0, w1, w2, w3, w4, w_small, b_all, out_ref):
    """One batch tile through all 8 layers; weights stay resident in VMEM.

    The tile is split into two independent halves (when >=16 rows) and the layer
    chain is interleaved across them so the scheduler can overlap one half's matmul
    with the other half's bias-add/ReLU and MXU result drain.
    """
    big = (w0, w1, w2, w3, w4)
    tm = x_ref.shape[0]
    x = x_ref[...].astype(jnp.bfloat16)
    if tm >= 16 and tm % 16 == 0:
        half = tm // 2
        bounds = ((0, half), (half, tm))
    else:
        bounds = ((0, tm),)
    hs = [x[lo:hi, :] for lo, hi in bounds]

    for i in range(N_LAYERS):
        pout = PAD_DIMS[i + 1]
        w = big[i][...] if i < N_BIG else w_small[i - N_BIG]   # bf16 [in_pad, out_pad]
        b = b_all[i:i + 1, :pout]                              # f32  [1, out_pad]
        for j, (lo, hi) in enumerate(bounds):
            acc = jnp.dot(hs[j], w, preferred_element_type=jnp.float32) + b
            if i < N_LAYERS - 1:
                hs[j] = jnp.maximum(acc, 0.0).astype(jnp.bfloat16)  # ReLU, recast for MXU
            else:
                out_ref[lo:hi, :] = acc.astype(out_ref.dtype)


# TODO(synk): for latency-critical B<=32 serving, keep the ~1.7 MiB weight set resident
# across calls via a cross-call prefetch (semaphore/VMEM-ref outputs) instead of
# re-DMAing it every invocation.
@jax.jit
def neural_network_forward(x, params):
    """x: [B, 1, 28, 28] float32 (NCHW).  params: dict from init_params()."""
    batch = x.shape[0]
    x_flat = x.reshape(batch, -1).astype(jnp.float32)   # nn.Flatten -> [B, 784]

    tile_b, n_tiles = _choose_grid(batch)
    b_pad = tile_b * n_tiles
    if b_pad != batch:
        x_flat = jnp.pad(x_flat, ((0, b_pad - batch), (0, 0)))

    w_big, w_small, b_all = params["w_big"], params["w_small"], params["b_all"]
    use_single_buffer = _single_buffer_supported()

    def const_spec(shape):
        # Constant index_map -> fetched once, kept resident across batch tiles.
        idx = lambda i, _n=len(shape): (0,) * _n
        if use_single_buffer:
            return pl.BlockSpec(shape, idx, pipeline_mode=pl.Buffered(1))
        return pl.BlockSpec(shape, idx)

    in_specs = [pl.BlockSpec((tile_b, LAYER_DIMS[0]), lambda i: (i, 0))]
    in_specs += [const_spec(w.shape) for w in w_big]
    in_specs += [const_spec(w_small.shape), const_spec(b_all.shape)]

    out = pl.pallas_call(
        mlp_kernel,
        out_shape=jax.ShapeDtypeStruct((b_pad, OUT_PAD), jnp.float32),
        grid=(n_tiles,),
        in_specs=in_specs,
        out_specs=pl.BlockSpec((tile_b, OUT_PAD), lambda i: (i, 0)),
        compiler_params=pltpu.CompilerParams(
            dimension_semantics=("parallel",),      # shards batch tiles across TCs
            vmem_limit_bytes=64 * 1024 * 1024,      # big tiles still compile on v5e
        ),
    )(x_flat, *w_big, w_small, b_all)

    # Slice away batch padding and the lane padding on the logits (128 -> 10).
    return out[:batch, :LAYER_DIMS[-1]]


def init_params(key):
    """Torch nn.Linear default init U(-1/sqrt(in), 1/sqrt(in)), zero-padded to lane
    multiples; weights bf16, biases f32.  Tail 128x128 weights are stacked and all
    biases packed into one [8, 512] array (cuts pallas_call input refs 18 -> 8)."""
    w_big, w_small_list = [], []
    b_all = jnp.zeros((N_LAYERS, BIAS_PAD), jnp.float32)
    for i in range(N_LAYERS):
        fan_in, fan_out = LAYER_DIMS[i], LAYER_DIMS[i + 1]
        pin, pout = PAD_DIMS[i], PAD_DIMS[i + 1]
        key, kw, kb = jax.random.split(key, 3)
        bound = 1.0 / jnp.sqrt(float(fan_in))
        w = jax.random.uniform(kw, (fan_in, fan_out), jnp.float32, -bound, bound)
        b = jax.random.uniform(kb, (fan_out,), jnp.float32, -bound, bound)
        # Zero padding keeps padded lanes exactly zero through the ReLU chain.
        w_pad = jnp.zeros((pin, pout), jnp.float32).at[:fan_in, :fan_out].set(w)
        w_pad = w_pad.astype(jnp.bfloat16)
        if i < N_BIG:
            w_big.append(w_pad)
        else:
            w_small_list.append(w_pad)
        b_all = b_all.at[i, :fan_out].set(b)
    return {"w_big": tuple(w_big), "w_small": jnp.stack(w_small_list), "b_all": b_all}


def reference_forward(x, params):
    """Pure-JAX reference with the same bf16-operand / f32-accumulate precision."""
    w_big, w_small, b_all = params["w_big"], params["w_small"], params["b_all"]
    h = x.reshape(x.shape[0], -1).astype(jnp.bfloat16)
    out = None
    for i in range(N_LAYERS):
        pout = PAD_DIMS[i + 1]
        w = w_big[i] if i < N_BIG else w_small[i - N_BIG]
        acc = jnp.dot(h, w, preferred_element_type=jnp.float32) + b_all[i:i + 1, :pout]
        if i < N_LAYERS - 1:
            h = jnp.maximum(acc, 0.0).astype(jnp.bfloat16)
        else:
            out = acc
    return out[:, :LAYER_DIMS[-1]]


if __name__ == "__main__":
    key = jax.random.PRNGKey(0)
    key, kx, kx2 = jax.random.split(key, 3)
    params = init_params(key)

    # Small latency-style batch (single grid step), NCHW like FashionMNIST.
    B = 2
    x = jax.random.normal(kx, (B, 1, 28, 28), jnp.float32)
    out = jax.block_until_ready(neural_network_forward(x, params))
    ref = reference_forward(x, params)
    assert out.shape == (B, LAYER_DIMS[-1]), out.shape
    assert jnp.allclose(out, ref, atol=1e-2, rtol=1e-2), "mismatch vs reference (B=2)"

    # Slightly larger batch to exercise the multi-tile / half-interleave paths.
    B2 = 48
    x2 = jax.random.normal(kx2, (B2, 1, 28, 28), jnp.float32)
    out2 = jax.block_until_ready(neural_network_forward(x2, params))
    ref2 = reference_forward(x2, params)
    assert out2.shape == (B2, LAYER_DIMS[-1]), out2.shape
    assert jnp.allclose(out2, ref2, atol=1e-2, rtol=1e-2), "mismatch vs reference (B=48)"

    print("KERNEL_OK")
</pallas_src>

<mosaic_0001>
module attributes {stable_mosaic.version = 11 : i64} {
  func.func @mlp_kernel(%arg0: i32, %arg1: memref<8x784xf32, #tpu.memory_space<vmem>>, %arg2: memref<784x512xbf16, #tpu.memory_space<vmem>>, %arg3: memref<512x384xbf16, #tpu.memory_space<vmem>>, %arg4: memref<384x256xbf16, #tpu.memory_space<vmem>>, %arg5: memref<256x256xbf16, #tpu.memory_space<vmem>>, %arg6: memref<256x128xbf16, #tpu.memory_space<vmem>>, %arg7: memref<3x128x128xbf16, #tpu.memory_space<vmem>>, %arg8: memref<8x512xf32, #tpu.memory_space<vmem>>, %arg9: memref<8x128xf32, #tpu.memory_space<vmem>>) attributes {dimension_semantics = [#tpu.dimension_semantics<parallel>], iteration_bounds = array<i64: 1>, scalar_prefetch = 0 : i64, scratch_operands = 0 : i64, tpu.core_type = #tpu.core_type<tc>, window_params = [{transform_indices = @transform_0, window_bounds = array<i64: 8, 784>}, {pipeline_mode = #tpu.pipeline_mode<synchronous>, transform_indices = @transform_1, window_bounds = array<i64: 784, 512>}, {pipeline_mode = #tpu.pipeline_mode<synchronous>, transform_indices = @transform_2, window_bounds = array<i64: 512, 384>}, {pipeline_mode = #tpu.pipeline_mode<synchronous>, transform_indices = @transform_3, window_bounds = array<i64: 384, 256>}, {pipeline_mode = #tpu.pipeline_mode<synchronous>, transform_indices = @transform_4, window_bounds = array<i64: 256, 256>}, {pipeline_mode = #tpu.pipeline_mode<synchronous>, transform_indices = @transform_5, window_bounds = array<i64: 256, 128>}, {pipeline_mode = #tpu.pipeline_mode<synchronous>, transform_indices = @transform_6, window_bounds = array<i64: 3, 128, 128>}, {pipeline_mode = #tpu.pipeline_mode<synchronous>, transform_indices = @transform_7, window_bounds = array<i64: 8, 512>}, {transform_indices = @transform_8, window_bounds = array<i64: 8, 128>}]} {
    %c0 = arith.constant 0 : index
    %c0_0 = arith.constant 0 : index
    %0 = vector.load %arg1[%c0, %c0_0] : memref<8x784xf32, #tpu.memory_space<vmem>>, vector<8x784xf32>
    %1 = arith.truncf %0 : vector<8x784xf32> to vector<8x784xbf16>
    %c0_1 = arith.constant 0 : index
    %c0_2 = arith.constant 0 : index
    %2 = vector.load %arg2[%c0_1, %c0_2] : memref<784x512xbf16, #tpu.memory_space<vmem>>, vector<784x512xbf16>
    %c0_3 = arith.constant 0 : index
    %c0_4 = arith.constant 0 : index
    %3 = vector.load %arg8[%c0_3, %c0_4] : memref<8x512xf32, #tpu.memory_space<vmem>>, vector<1x512xf32>
    %cst = arith.constant dense<0.000000e+00> : vector<8x512xf32>
    %4 = tpu.matmul %1, %2, %cst {dimension_numbers = #tpu.dot_dimension_numbers<[1], [0], [0], [1], [0, 0, 1, 1], [], []>} : vector<8x784xbf16>, vector<784x512xbf16>, vector<8x512xf32> -> vector<8x512xf32>
    %5 = vector.broadcast %3 : vector<1x512xf32> to vector<8x512xf32>
    %6 = arith.addf %4, %5 : vector<8x512xf32>
    %cst_5 = arith.constant 0.000000e+00 : f32
    %7 = vector.broadcast %cst_5 : f32 to vector<8x512xf32>
    %8 = arith.maximumf %6, %7 : vector<8x512xf32>
    %9 = arith.truncf %8 : vector<8x512xf32> to vector<8x512xbf16>
    %c0_6 = arith.constant 0 : index
    %c0_7 = arith.constant 0 : index
    %10 = vector.load %arg3[%c0_6, %c0_7] : memref<512x384xbf16, #tpu.memory_space<vmem>>, vector<512x384xbf16>
    %c1 = arith.constant 1 : index
    %c0_8 = arith.constant 0 : index
    %11 = vector.load %arg8[%c1, %c0_8] : memref<8x512xf32, #tpu.memory_space<vmem>>, vector<1x384xf32>
    %cst_9 = arith.constant dense<0.000000e+00> : vector<8x384xf32>
    %12 = tpu.matmul %9, %10, %cst_9 {dimension_numbers = #tpu.dot_dimension_numbers<[1], [0], [0], [1], [0, 0, 1, 1], [], []>} : vector<8x512xbf16>, vector<512x384xbf16>, vector<8x384xf32> -> vector<8x384xf32>
    %13 = vector.broadcast %11 : vector<1x384xf32> to vector<8x384xf32>
    %14 = arith.addf %12, %13 : vector<8x384xf32>
    %cst_10 = arith.constant 0.000000e+00 : f32
    %15 = vector.broadcast %cst_10 : f32 to vector<8x384xf32>
    %16 = arith.maximumf %14, %15 : vector<8x384xf32>
    %17 = arith.truncf %16 : vector<8x384xf32> to vector<8x384xbf16>
    %c0_11 = arith.constant 0 : index
    %c0_12 = arith.constant 0 : index
    %18 = vector.load %arg4[%c0_11, %c0_12] : memref<384x256xbf16, #tpu.memory_space<vmem>>, vector<384x256xbf16>
    %c2 = arith.constant 2 : index
    %c0_13 = arith.constant 0 : index
    %19 = vector.load %arg8[%c2, %c0_13] : memref<8x512xf32, #tpu.memory_space<vmem>>, vector<1x256xf32>
    %cst_14 = arith.constant dense<0.000000e+00> : vector<8x256xf32>
    %20 = tpu.matmul %17, %18, %cst_14 {dimension_numbers = #tpu.dot_dimension_numbers<[1], [0], [0], [1], [0, 0, 1, 1], [], []>} : vector<8x384xbf16>, vector<384x256xbf16>, vector<8x256xf32> -> vector<8x256xf32>
    %21 = vector.broadcast %19 : vector<1x256xf32> to vector<8x256xf32>
    %22 = arith.addf %20, %21 : vector<8x256xf32>
    %cst_15 = arith.constant 0.000000e+00 : f32
    %23 = vector.broadcast %cst_15 : f32 to vector<8x256xf32>
    %24 = arith.maximumf %22, %23 : vector<8x256xf32>
    %25 = arith.truncf %24 : vector<8x256xf32> to vector<8x256xbf16>
    %c0_16 = arith.constant 0 : index
    %c0_17 = arith.constant 0 : index
    %26 = vector.load %arg5[%c0_16, %c0_17] : memref<256x256xbf16, #tpu.memory_space<vmem>>, vector<256x256xbf16>
    %c3 = arith.constant 3 : index
    %c0_18 = arith.constant 0 : index
    %27 = vector.load %arg8[%c3, %c0_18] : memref<8x512xf32, #tpu.memory_space<vmem>>, vector<1x256xf32>
    %cst_19 = arith.constant dense<0.000000e+00> : vector<8x256xf32>
    %28 = tpu.matmul %25, %26, %cst_19 {dimension_numbers = #tpu.dot_dimension_numbers<[1], [0], [0], [1], [0, 0, 1, 1], [], []>} : vector<8x256xbf16>, vector<256x256xbf16>, vector<8x256xf32> -> vector<8x256xf32>
    %29 = vector.broadcast %27 : vector<1x256xf32> to vector<8x256xf32>
    %30 = arith.addf %28, %29 : vector<8x256xf32>
    %cst_20 = arith.constant 0.000000e+00 : f32
    %31 = vector.broadcast %cst_20 : f32 to vector<8x256xf32>
    %32 = arith.maximumf %30, %31 : vector<8x256xf32>
    %33 = arith.truncf %32 : vector<8x256xf32> to vector<8x256xbf16>
    %c0_21 = arith.constant 0 : index
    %c0_22 = arith.constant 0 : index
    %34 = vector.load %arg6[%c0_21, %c0_22] : memref<256x128xbf16, #tpu.memory_space<vmem>>, vector<256x128xbf16>
    %c4 = arith.constant 4 : index
    %c0_23 = arith.constant 0 : index
    %35 = vector.load %arg8[%c4, %c0_23] : memref<8x512xf32, #tpu.memory_space<vmem>>, vector<1x128xf32>
    %cst_24 = arith.constant dense<0.000000e+00> : vector<8x128xf32>
    %36 = tpu.matmul %33, %34, %cst_24 {dimension_numbers = #tpu.dot_dimension_numbers<[1], [0], [0], [1], [0, 0, 1, 1], [], []>} : vector<8x256xbf16>, vector<256x128xbf16>, vector<8x128xf32> -> vector<8x128xf32>
    %37 = vector.broadcast %35 : vector<1x128xf32> to vector<8x128xf32>
    %38 = arith.addf %36, %37 : vector<8x128xf32>
    %cst_25 = arith.constant 0.000000e+00 : f32
    %39 = vector.broadcast %cst_25 : f32 to vector<8x128xf32>
    %40 = arith.maximumf %38, %39 : vector<8x128xf32>
    %41 = arith.truncf %40 : vector<8x128xf32> to vector<8x128xbf16>
    %c0_26 = arith.constant 0 : index
    %c0_27 = arith.constant 0 : index
    %c0_28 = arith.constant 0 : index
    %42 = vector.load %arg7[%c0_26, %c0_27, %c0_28] : memref<3x128x128xbf16, #tpu.memory_space<vmem>>, vector<1x128x128xbf16>
    %43 = vector.shape_cast %42 : vector<1x128x128xbf16> to vector<128x128xbf16>
    %c5 = arith.constant 5 : index
    %c0_29 = arith.constant 0 : index
    %44 = vector.load %arg8[%c5, %c0_29] : memref<8x512xf32, #tpu.memory_space<vmem>>, vector<1x128xf32>
    %cst_30 = arith.constant dense<0.000000e+00> : vector<8x128xf32>
    %45 = tpu.matmul %41, %43, %cst_30 {dimension_numbers = #tpu.dot_dimension_numbers<[1], [0], [0], [1], [0, 0, 1, 1], [], []>} : vector<8x128xbf16>, vector<128x128xbf16>, vector<8x128xf32> -> vector<8x128xf32>
    %46 = vector.broadcast %44 : vector<1x128xf32> to vector<8x128xf32>
    %47 = arith.addf %45, %46 : vector<8x128xf32>
    %cst_31 = arith.constant 0.000000e+00 : f32
    %48 = vector.broadcast %cst_31 : f32 to vector<8x128xf32>
    %49 = arith.maximumf %47, %48 : vector<8x128xf32>
    %50 = arith.truncf %49 : vector<8x128xf32> to vector<8x128xbf16>
    %c1_32 = arith.constant 1 : index
    %c0_33 = arith.constant 0 : index
    %c0_34 = arith.constant 0 : index
    %51 = vector.load %arg7[%c1_32, %c0_33, %c0_34] : memref<3x128x128xbf16, #tpu.memory_space<vmem>>, vector<1x128x128xbf16>
    %52 = vector.shape_cast %51 : vector<1x128x128xbf16> to vector<128x128xbf16>
    %c6 = arith.constant 6 : index
    %c0_35 = arith.constant 0 : index
    %53 = vector.load %arg8[%c6, %c0_35] : memref<8x512xf32, #tpu.memory_space<vmem>>, vector<1x128xf32>
    %cst_36 = arith.constant dense<0.000000e+00> : vector<8x128xf32>
    %54 = tpu.matmul %50, %52, %cst_36 {dimension_numbers = #tpu.dot_dimension_numbers<[1], [0], [0], [1], [0, 0, 1, 1], [], []>} : vector<8x128xbf16>, vector<128x128xbf16>, vector<8x128xf32> -> vector<8x128xf32>
    %55 = vector.broadcast %53 : vector<1x128xf32> to vector<8x128xf32>
    %56 = arith.addf %54, %55 : vector<8x128xf32>
    %cst_37 = arith.constant 0.000000e+00 : f32
    %57 = vector.broadcast %cst_37 : f32 to vector<8x128xf32>
    %58 = arith.maximumf %56, %57 : vector<8x128xf32>
    %59 = arith.truncf %58 : vector<8x128xf32> to vector<8x128xbf16>
    %c2_38 = arith.constant 2 : index
    %c0_39 = arith.constant 0 : index
    %c0_40 = arith.constant 0 : index
    %60 = vector.load %arg7[%c2_38, %c0_39, %c0_40] : memref<3x128x128xbf16, #tpu.memory_space<vmem>>, vector<1x128x128xbf16>
    %61 = vector.shape_cast %60 : vector<1x128x128xbf16> to vector<128x128xbf16>
    %c7 = arith.constant 7 : index
    %c0_41 = arith.constant 0 : index
    %62 = vector.load %arg8[%c7, %c0_41] : memref<8x512xf32, #tpu.memory_space<vmem>>, vector<1x128xf32>
    %cst_42 = arith.constant dense<0.000000e+00> : vector<8x128xf32>
    %63 = tpu.matmul %59, %61, %cst_42 {dimension_numbers = #tpu.dot_dimension_numbers<[1], [0], [0], [1], [0, 0, 1, 1], [], []>} : vector<8x128xbf16>, vector<128x128xbf16>, vector<8x128xf32> -> vector<8x128xf32>
    %64 = vector.broadcast %62 : vector<1x128xf32> to vector<8x128xf32>
    %65 = arith.addf %63, %64 : vector<8x128xf32>
    %c0_43 = arith.constant 0 : index
    %c0_44 = arith.constant 0 : index
    %66 = vector.load %arg9[%c0_43, %c0_44] : memref<8x128xf32, #tpu.memory_space<vmem>>, vector<8x128xf32>
    tpu.vector_store %arg9[%c0_43, %c0_44], %65 {strides = array<i32>} : memref<8x128xf32, #tpu.memory_space<vmem>>, vector<8x128xf32>,
    return
  }
  func.func @transform_0(%arg0: i32) -> (i32, i32) {
    %c0_i32 = arith.constant 0 : i32
    %c0_i32_0 = arith.constant 0 : i32
    return %arg0, %c0_i32 : i32, i32
  }
  func.func @transform_1(%arg0: i32) -> (i32, i32) {
    %c0_i32 = arith.constant 0 : i32
    %c0_i32_0 = arith.constant 0 : i32
    %c0_i32_1 = arith.constant 0 : i32
    return %c0_i32, %c0_i32_0 : i32, i32
  }
  func.func @transform_2(%arg0: i32) -> (i32, i32) {
    %c0_i32 = arith.constant 0 : i32
    %c0_i32_0 = arith.constant 0 : i32
    %c0_i32_1 = arith.constant 0 : i32
    return %c0_i32, %c0_i32_0 : i32, i32
  }
  func.func @transform_3(%arg0: i32) -> (i32, i32) {
    %c0_i32 = arith.constant 0 : i32
    %c0_i32_0 = arith.constant 0 : i32
    %c0_i32_1 = arith.constant 0 : i32
    return %c0_i32, %c0_i32_0 : i32, i32
  }
  func.func @transform_4(%arg0: i32) -> (i32, i32) {
    %c0_i32 = arith.constant 0 : i32
    %c0_i32_0 = arith.constant 0 : i32
    %c0_i32_1 = arith.constant 0 : i32
    return %c0_i32, %c0_i32_0 : i32, i32
  }
  func.func @transform_5(%arg0: i32) -> (i32, i32) {
    %c0_i32 = arith.constant 0 : i32
    %c0_i32_0 = arith.constant 0 : i32
    %c0_i32_1 = arith.constant 0 : i32
    return %c0_i32, %c0_i32_0 : i32, i32
  }
  func.func @transform_6(%arg0: i32) -> (i32, i32, i32) {
    %c0_i32 = arith.constant 0 : i32
    %c0_i32_0 = arith.constant 0 : i32
    %c0_i32_1 = arith.constant 0 : i32
    %c0_i32_2 = arith.constant 0 : i32
    return %c0_i32, %c0_i32_0, %c0_i32_1 : i32, i32, i32
  }
  func.func @transform_7(%arg0: i32) -> (i32, i32) {
    %c0_i32 = arith.constant 0 : i32
    %c0_i32_0 = arith.constant 0 : i32
    %c0_i32_1 = arith.constant 0 : i32
    return %c0_i32, %c0_i32_0 : i32, i32
  }
  func.func @transform_8(%arg0: i32) -> (i32, i32) {
    %c0_i32 = arith.constant 0 : i32
    %c0_i32_0 = arith.constant 0 : i32
    return %arg0, %c0_i32 : i32, i32
  }
}

</mosaic_0001>

<bundles_post_ra>
// kernel: neural_network_forward.1
= control target key start
LH: loop header
LB: loop body
LE: loop exit
PB: predicated region body
PF: predicated region fallthrough
CT: control target
= control target key end

     0   :  { %13 = vsyncpa [#allocation3], 0  ;;  %s5217_s0 = inlined_call_operand.vmem [shape: f32[8,784], index: 0, kind: input, shape index: {}]   ;;  %s5218_s1 = inlined_call_operand.hbm [shape: bf16[784,512], index: 1, kind: input, shape index: {}]   ;;  %s5219_s2 = inlined_call_operand.hbm [shape: bf16[512,384], index: 2, kind: input, shape index: {}]   ;;  %s5220_s3 = inlined_call_operand.hbm [shape: bf16[384,256], index: 3, kind: input, shape index: {}]   ;;  %s5221_s4 = inlined_call_operand.vmem [shape: bf16[256,256], index: 4, kind: input, shape index: {}]   ;;  %s5222_s5 = inlined_call_operand.hbm [shape: bf16[256,128], index: 5, kind: input, shape index: {}]   ;;  %s5223_s6 = inlined_call_operand.hbm [shape: bf16[3,128,128], index: 6, kind: input, shape index: {}]   ;;  %s5224_s7 = inlined_call_operand.hbm [shape: f32[8,512], index: 7, kind: input, shape index: {}]   ;;  %s5225_s8 = inlined_call_operand.vmem [shape: f32[8,128], index: 8, kind: output, shape index: {}]  }
   0x1   :  { %14 = vsyncpa [#allocation5], 0 }
   0x2   :  { %15 = vsyncpa [#allocation8], 0 }
   0x3   :  { %16 = vsyncpa [#allocation11], 0  ;;  %s4920_s27 = smov [#allocation4]  }
   0x4   :  { %s36_s28 = sshll.u32 %s4920_s27, 4  ;;  %s37_s28 = int_to_ptr.vmem [resolvable:$true] %s36_s28 }
   0x5   :  { %s4800_s29 = scalar_lea.vmem %s37_s28, 12288  ;;  %p4805_p1 = scmp.lt.s32.totalorder %s37_s28, %s37_s28 }
   0x6   :  { %p4801_p0 = scmp.ne.s32.totalorder %s37_s28, %s4800_s29  ;;  %p4806_p2 = scmp.lt.s32.totalorder %s4800_s29, %s4800_s29 }
   0x8   :  { %p4807_p3 = por %p4806_p2, %p4805_p1 }
   0xa   :  { %p4808_p4 = pnand %p4807_p3, %p4801_p0 }
   0xc   :  { %4811 = shalt.err (!%p4808_p4)
}
   0xd   :  { %s4921_s30 = smov 192   ;;  %s4922_s9 = smov 12  }
   0xe   :  { %42 = dma.hbm_to_vmem [thread:$0]  %s5219_s2, 12288, %s37_s28, [#allocation5], %s4921_s30, %s4921_s30, %s4922_s9  }
   0xf   :  { %s4923_s12 = smov [#allocation7]  }
  0x10   :  { %s62_s13 = sshll.u32 %s4923_s12, 4  ;;  %s63_s13 = int_to_ptr.vmem [resolvable:$true] %s62_s13 }
  0x11   :  { %s4820_s14 = scalar_lea.vmem %s63_s13, 2048  ;;  %p4825_p6 = scmp.lt.s32.totalorder %s63_s13, %s63_s13 }
  0x12   :  { %p4821_p5 = scmp.ne.s32.totalorder %s63_s13, %s4820_s14  ;;  %p4826_p7 = scmp.lt.s32.totalorder %s4820_s14, %s4820_s14 }
  0x14   :  { %p4827_p8 = por %p4826_p7, %p4825_p6 }
  0x16   :  { %p4828_p9 = pnand %p4827_p8, %p4821_p5 }
  0x18   :  { %4831 = shalt.err (!%p4828_p9)
}
  0x19   :  { %s4924_s15 = smov 64   ;;  %s4925_s16 = smov 4  }
  0x1a   :  { %68 = dma.hbm_to_vmem [thread:$0]  %s5222_s5, 2048, %s63_s13, [#allocation8], %s4924_s15, %s4924_s15, %s4925_s16  }
  0x1b   :  { %s4926_s2 = smov [#allocation2]  }
  0x1c   :  { %s24_s19 = sshll.u32 %s4926_s2, 4  ;;  %s25_s19 = int_to_ptr.vmem [resolvable:$true] %s24_s19 }
  0x1d   :  { %s4840_s20 = scalar_lea.vmem %s25_s19, 25088  ;;  %p4845_p11 = scmp.lt.s32.totalorder %s25_s19, %s25_s19 }
  0x1e   :  { %p4841_p10 = scmp.ne.s32.totalorder %s25_s19, %s4840_s20  ;;  %p4846_p12 = scmp.lt.s32.totalorder %s4840_s20, %s4840_s20 }
  0x20   :  { %p4847_p13 = por %p4846_p12, %p4845_p11 }
  0x22   :  { %p4848_p0 = pnand %p4847_p13, %p4841_p10 }
  0x24   :  { %4851 = shalt.err (!%p4848_p0)
}
  0x25   :  { %s4927_s21 = smov 256   ;;  %s4928_s22 = smov 16  }
  0x26   :  { %30 = dma.hbm_to_vmem [thread:$0]  %s5218_s1, 25088, %s25_s19, [#allocation3], %s4927_s21, %s4927_s21, %s4928_s22  }
  0x27   :  { %s4929_s25 = smov [#allocation6]  }
  0x28   :  { %s48_s26 = sshll.u32 %s4929_s25, 4  ;;  %s49_s26 = int_to_ptr.vmem [resolvable:$true] %s48_s26 }
  0x29   :  { %s4860_s5 = scalar_lea.vmem %s49_s26, 6144  ;;  %p4865_p2 = scmp.lt.s32.totalorder %s49_s26, %s49_s26 }
  0x2a   :  { %p4861_p1 = scmp.ne.s32.totalorder %s49_s26, %s4860_s5  ;;  %p4866_p3 = scmp.lt.s32.totalorder %s4860_s5, %s4860_s5 }
  0x2c   :  { %p4867_p4 = por %p4866_p3, %p4865_p2 }
  0x2e   :  { %p4868_p5 = pnand %p4867_p4, %p4861_p1 }
  0x30   :  { %4871 = shalt.err (!%p4868_p5)
}
  0x31   :  { %s4930_s27 = smov 128   ;;  %s4931_s28 = smov 8  }
  0x32   :  { %54 = dma.hbm_to_vmem [thread:$0]  %s5220_s3, 6144, %s49_s26, [#allocation5], %s4930_s27, %s4930_s27, %s4931_s28  }
  0x33   :  { %s4932_s9 = smov [#allocation9]   ;;  %s4933_s11 = smov [#allocation10]  }
  0x34   :  { %s74_s10 = sshll.u32 %s4932_s9, 4  ;;  %s87_s1 = sshll.u32 %s4933_s11, 4  ;;  %s75_s10 = int_to_ptr.vmem [resolvable:$true] %s74_s10  ;;  %s88_s1 = int_to_ptr.vmem [resolvable:$true] %s87_s1 }
  0x35   :  { %s4880_s12 = scalar_lea.vmem %s75_s10, 3072  ;;  %p4885_p7 = scmp.lt.s32.totalorder %s75_s10, %s75_s10 }
  0x36   :  { %p4881_p6 = scmp.ne.s32.totalorder %s75_s10, %s4880_s12  ;;  %p4886_p8 = scmp.lt.s32.totalorder %s4880_s12, %s4880_s12 }
  0x38   :  { %p4887_p9 = por %p4886_p8, %p4885_p7 }
  0x3a   :  { %p4888_p10 = pnand %p4887_p9, %p4881_p6 }
  0x3c   :  { %4891 = shalt.err (!%p4888_p10)
}
  0x3d   :  { %80 = dma.hbm_to_vmem [thread:$0]  %s5223_s6, 3072, %s75_s10, [#allocation8], %s4924_s15, %s4924_s15, %s4925_s16  }
  0x3e   :  { %s4900_s3 = scalar_lea.vmem %s88_s1, 512  ;;  %p4905_p12 = scmp.lt.s32.totalorder %s88_s1, %s88_s1 }
  0x3f   :  { %p4901_p11 = scmp.ne.s32.totalorder %s88_s1, %s4900_s3  ;;  %p4906_p13 = scmp.lt.s32.totalorder %s4900_s3, %s4900_s3 }
  0x41   :  { %p4907_p0 = por %p4906_p13, %p4905_p12 }
  0x43   :  { %p4908_p1 = pnand %p4907_p0, %p4901_p11 }
  0x45   :  { %4911 = shalt.err (!%p4908_p1)
}
  0x46   :  { %90 = dma.hbm_to_vmem [thread:$0]  %s5224_s7, 512, %s88_s1, [#allocation11]  }
  0x47   :  { %4912 = dma.done.wait [#allocation3], 25088  }
  0x48   :  { %4913 = vsyncadd [#allocation3], 4294942208 }
  0x49   :  { %4914 = dma.done.wait [#allocation5], 18432  }
  0x4a   :  { %4915 = vsyncadd [#allocation5], 4294948864 }
  0x4b   :  { %4916 = dma.done.wait [#allocation8], 5120  }
  0x4c   :  { %4917 = vsyncadd [#allocation8], 4294962176 }
  0x4d   :  { %4918 = dma.done.wait [#allocation11], 512  }
  0x4e   :  { %4919 = vsyncadd [#allocation11], 4294966784  ;;  %v4210_v0 = vld [vmem:[#allocation2 + $0xe4] ss:$16 sps:$4 sm:$0xff]   ;;  %v4214_v2 = vld [vmem:[#allocation2 + $0xe0] ss:$16 sps:$4 sm:$0xff]  }
  0x4f   :  { %v4212_v1 = vld [vmem:[#allocation2 + $0x2e4] ss:$16 sps:$4 sm:$0xff]   ;;  %1326 = vmatprep.subr.bf16.mxu0 %v4210_v0  ;;  %v4215_v3 = vld [vmem:[#allocation2 + $0x2e0] ss:$16 sps:$4 sm:$0xff]   ;;  %v111_v46 = vld [vmem:[%s5217_s0 + $0x8] sm:$0xff]  ;;  %vm1322_vm0 = vcmask 130048  }
  0x50   :  { %1367 = vmatprep.subr.bf16.mxu1 %v4212_v1  ;;  %v4216_v4 = vld [vmem:[#allocation2 + $0xc4] ss:$16 sps:$4 sm:$0xff]   ;;  %1327 = vmatpush1.bf16.msra.mxu0 %v4214_v2  ;;  %v4220_v6 = vld [vmem:[#allocation2 + $0xc0] ss:$16 sps:$4 sm:$0xff]   ;;  %v5009_v49 = vpack.c.bf16 %v111_v46, %v111_v46  ;;  %v113_v50 = vld [vmem:[%s5217_s0 + $0x18] sm:$0xff]  ;;  %vm4936_vm1 = vmmov 0  }
  0x51   :  { %1368 = vmatpush1.bf16.msra.mxu1 %v4215_v3  ;;  %v4218_v5 = vld [vmem:[#allocation2 + $0x2c4] ss:$16 sps:$4 sm:$0xff]   ;;  %1328 = vmatprep.subr.bf16.mxu0 %v4216_v4  ;;  %v4221_v7 = vld [vmem:[#allocation2 + $0x2c0] ss:$16 sps:$4 sm:$0xff]   ;;  %v5014_v52 = vpack.c.bf16 %v113_v50, %v113_v50 }
  0x52   :  { %1369 = vmatprep.subr.bf16.mxu1 %v4218_v5  ;;  %v4222_v8 = vld [vmem:[#allocation2 + $0xa4] ss:$16 sps:$4 sm:$0xff]   ;;  %v4226_v10 = vld [vmem:[#allocation2 + $0xa0] ss:$16 sps:$4 sm:$0xff]   ;;  %1358 = vmatprep.mubr.bf16.mxu0 %v5009_v49 }
  0x53   :  { %v4224_v9 = vld [vmem:[#allocation2 + $0x2a4] ss:$16 sps:$4 sm:$0xff]   ;;  %v4227_v11 = vld [vmem:[#allocation2 + $0x2a0] ss:$16 sps:$4 sm:$0xff]   ;;  %1399 = vmatprep.mubr.bf16.mxu1 %v5014_v52 }
  0x54   :  { %1329 = vmatpush1.bf16.msra.mxu0 %v4220_v6  ;;  %v4228_v12 = vld [vmem:[#allocation2 + $0x84] ss:$16 sps:$4 sm:$0xff]   ;;  %v4232_v14 = vld [vmem:[#allocation2 + $0x80] ss:$16 sps:$4 sm:$0xff]  }
  0x55   :  { %1370 = vmatpush1.bf16.msra.mxu1 %v4221_v7  ;;  %1330 = vmatprep.subr.bf16.mxu0 %v4222_v8  ;;  %v4230_v13 = vld [vmem:[#allocation2 + $0x284] ss:$16 sps:$4 sm:$0xff]   ;;  %v4233_v15 = vld [vmem:[#allocation2 + $0x280] ss:$16 sps:$4 sm:$0xff]  }
  0x56   :  { %1371 = vmatprep.subr.bf16.mxu1 %v4224_v9  ;;  %v4234_v16 = vld [vmem:[#allocation2 + $0x64] ss:$16 sps:$4 sm:$0xff]   ;;  %v4238_v18 = vld [vmem:[#allocation2 + $0x60] ss:$16 sps:$4 sm:$0xff]  }
  0x57   :  { %v4236_v17 = vld [vmem:[#allocation2 + $0x264] ss:$16 sps:$4 sm:$0xff]   ;;  %v4239_v19 = vld [vmem:[#allocation2 + $0x260] ss:$16 sps:$4 sm:$0xff]  }
  0x58   :  { %1331 = vmatpush1.bf16.msra.mxu0 %v4226_v10  ;;  %v4240_v20 = vld [vmem:[#allocation2 + $0x44] ss:$16 sps:$4 sm:$0xff]   ;;  %v4244_v22 = vld [vmem:[#allocation2 + $0x40] ss:$16 sps:$4 sm:$0xff]  }
  0x59   :  { %1372 = vmatpush1.bf16.msra.mxu1 %v4227_v11  ;;  %1332 = vmatprep.subr.bf16.mxu0 %v4228_v12  ;;  %v4242_v21 = vld [vmem:[#allocation2 + $0x244] ss:$16 sps:$4 sm:$0xff]   ;;  %v4245_v23 = vld [vmem:[#allocation2 + $0x240] ss:$16 sps:$4 sm:$0xff]  }
  0x5a   :  { %1373 = vmatprep.subr.bf16.mxu1 %v4230_v13  ;;  %v4246_v24 = vld [vmem:[#allocation2 + $0x24] ss:$16 sps:$4 sm:$0xff]   ;;  %v4250_v26 = vld [vmem:[#allocation2 + $0x20] ss:$16 sps:$4 sm:$0xff]   ;;  %v4317_v13 = vld [vmem:[#allocation2 + $0xec] ss:$16 sps:$4 sm:$0xff]  }
  0x5b   :  { %v4248_v25 = vld [vmem:[#allocation2 + $0x224] ss:$16 sps:$4 sm:$0xff]   ;;  %v4251_v27 = vld [vmem:[#allocation2 + $0x220] ss:$16 sps:$4 sm:$0xff]  }
  0x5c   :  { %1333 = vmatpush1.bf16.msra.mxu0 %v4232_v14  ;;  %v4252_v28 = vld [vmem:[#allocation2 + $0x4] ss:$16 sps:$4 sm:$0xff]   ;;  %v4256_v30 = vld [vmem:[#allocation2] ss:$16 sps:$4 sm:$0xff]  }
  0x5d   :  { %1374 = vmatpush1.bf16.msra.mxu1 %v4233_v15  ;;  %1334 = vmatprep.subr.bf16.mxu0 %v4234_v16  ;;  %v4254_v29 = vld [vmem:[#allocation2 + $0x204] ss:$16 sps:$4 sm:$0xff]   ;;  %v4257_v31 = vld [vmem:[#allocation2 + $0x200] ss:$16 sps:$4 sm:$0xff]   ;;  %v4934_v16 = vmov 0  }
  0x5e   :  { %1375 = vmatprep.subr.bf16.mxu1 %v4236_v17  ;;  %v4258_v32 = vld [vmem:[#allocation2 + $0x1e4] ss:$16 sps:$4 sm:$0xff]   ;;  %v4262_v34 = vld [vmem:[#allocation2 + $0x1e0] ss:$16 sps:$4 sm:$0xff]  }
  0x5f   :  { %v4260_v33 = vld [vmem:[#allocation2 + $0x3e4] ss:$16 sps:$4 sm:$0xff]   ;;  %v4263_v35 = vld [vmem:[#allocation2 + $0x3e0] ss:$16 sps:$4 sm:$0xff]  }
  0x60   :  { %1335 = vmatpush1.bf16.msra.mxu0 %v4238_v18  ;;  %v4264_v36 = vld [vmem:[#allocation2 + $0x1c4] ss:$16 sps:$4 sm:$0xff]   ;;  %v4268_v38 = vld [vmem:[#allocation2 + $0x1c0] ss:$16 sps:$4 sm:$0xff]   ;;  %v4315_v18 = vld [vmem:[#allocation2 + $0xe8] ss:$16 sps:$4 sm:$0xff]  }
  0x61   :  { %1376 = vmatpush1.bf16.msra.mxu1 %v4239_v19  ;;  %1336 = vmatprep.subr.bf16.mxu0 %v4240_v20  ;;  %v4266_v37 = vld [vmem:[#allocation2 + $0x3c4] ss:$16 sps:$4 sm:$0xff]   ;;  %v4269_v39 = vld [vmem:[#allocation2 + $0x3c0] ss:$16 sps:$4 sm:$0xff]  }
  0x62   :  { %1377 = vmatprep.subr.bf16.mxu1 %v4242_v21  ;;  %v4270_v40 = vld [vmem:[#allocation2 + $0x1a4] ss:$16 sps:$4 sm:$0xff]   ;;  %v4274_v42 = vld [vmem:[#allocation2 + $0x1a0] ss:$16 sps:$4 sm:$0xff]   ;;  %v4323_v21 = vld [vmem:[#allocation2 + $0xcc] ss:$16 sps:$4 sm:$0xff]  }
  0x63   :  { %v4272_v41 = vld [vmem:[#allocation2 + $0x3a4] ss:$16 sps:$4 sm:$0xff]   ;;  %v4275_v43 = vld [vmem:[#allocation2 + $0x3a0] ss:$16 sps:$4 sm:$0xff]  }
  0x64   :  { %1337 = vmatpush1.bf16.msra.mxu0 %v4244_v22  ;;  %v4276_v44 = vld [vmem:[#allocation2 + $0x184] ss:$16 sps:$4 sm:$0xff]   ;;  %v4280_v47 = vld [vmem:[#allocation2 + $0x180] ss:$16 sps:$4 sm:$0xff]  }
  0x65   :  { %1378 = vmatpush1.bf16.msra.mxu1 %v4245_v23  ;;  %1338 = vmatprep.subr.bf16.mxu0 %v4246_v24  ;;  %v4278_v45 = vld [vmem:[#allocation2 + $0x384] ss:$16 sps:$4 sm:$0xff]   ;;  %v4281_v48 = vld [vmem:[#allocation2 + $0x380] ss:$16 sps:$4 sm:$0xff]   ;;  %v4321_v23 = vld [vmem:[#allocation2 + $0xc8] ss:$16 sps:$4 sm:$0xff]  }
  0x66   :  { %1379 = vmatprep.subr.bf16.mxu1 %v4248_v25  ;;  %v4282_v51 = vld [vmem:[#allocation2 + $0x164] ss:$16 sps:$4 sm:$0xff]   ;;  %v4286_v54 = vld [vmem:[#allocation2 + $0x160] ss:$16 sps:$4 sm:$0xff]   ;;  %v4329_v25 = vld [vmem:[#allocation2 + $0xac] ss:$16 sps:$4 sm:$0xff]  }
  0x67   :  { %v4284_v53 = vld [vmem:[#allocation2 + $0x364] ss:$16 sps:$4 sm:$0xff]   ;;  %v4287_v55 = vld [vmem:[#allocation2 + $0x360] ss:$16 sps:$4 sm:$0xff]  }
  0x68   :  { %1339 = vmatpush1.bf16.msra.mxu0 %v4250_v26  ;;  %v4288_v56 = vld [vmem:[#allocation2 + $0x144] ss:$16 sps:$4 sm:$0xff]   ;;  %v4292_v58 = vld [vmem:[#allocation2 + $0x140] ss:$16 sps:$4 sm:$0xff]  }
  0x69   :  { %1380 = vmatpush1.bf16.msra.mxu1 %v4251_v27  ;;  %1340 = vmatprep.subr.bf16.mxu0 %v4252_v28  ;;  %v4290_v57 = vld [vmem:[#allocation2 + $0x344] ss:$16 sps:$4 sm:$0xff]   ;;  %v4293_v59 = vld [vmem:[#allocation2 + $0x340] ss:$16 sps:$4 sm:$0xff]   ;;  %v4327_v27 = vld [vmem:[#allocation2 + $0xa8] ss:$16 sps:$4 sm:$0xff]  }
  0x6a   :  { %1381 = vmatprep.subr.bf16.mxu1 %v4254_v29  ;;  %v4294_v60 = vld [vmem:[#allocation2 + $0x124] ss:$16 sps:$4 sm:$0xff]   ;;  %v4298_v62 = vld [vmem:[#allocation2 + $0x120] ss:$16 sps:$4 sm:$0xff]   ;;  %v4335_v29 = vld [vmem:[#allocation2 + $0x8c] ss:$16 sps:$4 sm:$0xff]  }
  0x6b   :  { %v4296_v61 = vld [vmem:[#allocation2 + $0x324] ss:$16 sps:$4 sm:$0xff]   ;;  %v4299_v63 = vld [vmem:[#allocation2 + $0x320] ss:$16 sps:$4 sm:$0xff]  }
  0x6c   :  { %1341 = vmatpush1.bf16.msra.mxu0 %v4256_v30  ;;  %v4300_v0 = vld [vmem:[#allocation2 + $0x104] ss:$16 sps:$4 sm:$0xff]   ;;  %v4304_v2 = vld [vmem:[#allocation2 + $0x100] ss:$16 sps:$4 sm:$0xff]  }
  0x6d   :  { %1382 = vmatpush1.bf16.msra.mxu1 %v4257_v31  ;;  %1342 = vmatprep.subr.bf16.mxu0 %v4258_v32  ;;  %v4302_v1 = vld [vmem:[#allocation2 + $0x304] ss:$16 sps:$4 sm:$0xff]   ;;  %v4305_v3 = vld [vmem:[#allocation2 + $0x300] ss:$16 sps:$4 sm:$0xff]   ;;  %v4333_v31 = vld [vmem:[#allocation2 + $0x88] ss:$16 sps:$4 sm:$0xff]  }
  0x6e   :  { %1383 = vmatprep.subr.bf16.mxu1 %v4260_v33  ;;  %v110_v4 = vld [vmem:[%s5217_s0] sm:$0xff]  ;;  %v112_v5 = vld [vmem:[%s5217_s0 + $0x10] sm:$0xff]  ;;  %v4341_v33 = vld [vmem:[#allocation2 + $0x6c] ss:$16 sps:$4 sm:$0xff]  }
  0x6f   :  { %v4308_v6 = vld [vmem:[#allocation2 + $0x4e4] ss:$16 sps:$4 sm:$0xff]   ;;  %v5024_v8 = vpack.c.bf16 %v110_v4, %v110_v4  ;;  %v5026_v9 = vpack.c.bf16 %v112_v5, %v112_v5  ;;  %v4306_v10 = vld [vmem:[#allocation2 + $0x4e0] ss:$16 sps:$4 sm:$0xff]   ;;  %v4389_v4 = vld [vmem:[#allocation2 + $0x16c] ss:$16 sps:$4 sm:$0xff]  }
  0x70   :  { %1343 = vmatpush2.bf16.msra.mxu0 %v4262_v34  ;;  %v4311_v7 = vld [vmem:[#allocation2 + $0x604] ss:$16 sps:$4 sm:$0xff]   ;;  %v4309_v11 = vld [vmem:[#allocation2 + $0x600] ss:$16 sps:$4 sm:$0xff]  }
  0x71   :  { %1384 = vmatpush2.bf16.msra.mxu1 %v4263_v35  ;;  %1344 = vmatprep.subr.bf16.mxu0 %v4264_v36  ;;  %v4314_v12 = vld [vmem:[#allocation2 + $0x4c4] ss:$16 sps:$4 sm:$0xff]   ;;  %v4312_v14 = vld [vmem:[#allocation2 + $0x4c0] ss:$16 sps:$4 sm:$0xff]   ;;  %v115_v35 = vld [vmem:[%s5217_s0 + $0x28] sm:$0xff] }
  0x72   :  { %1385 = vmatprep.subr.bf16.mxu1 %v4266_v37  ;;  %v116_v15 = vld [vmem:[%s5217_s0 + $0x30] sm:$0xff]  ;;  %v5042_v36 = vpack.c.bf16 %v115_v35, %v115_v35  ;;  %v4339_v37 = vld [vmem:[#allocation2 + $0x68] ss:$16 sps:$4 sm:$0xff]   ;;  %v4428_v35 = vld [vmem:[#allocation2 + $0x26c] ss:$16 sps:$4 sm:$0xff]  }
  0x73   :  { %v4320_v17 = vld [vmem:[#allocation2 + $0x4a4] ss:$16 sps:$4 sm:$0xff]   ;;  %v5034_v19 = vpack.c.bf16 %v116_v15, %v116_v15  ;;  %v4318_v20 = vld [vmem:[#allocation2 + $0x4a0] ss:$16 sps:$4 sm:$0xff]  }
  0x74   :  { %1345 = vmatpush2.bf16.msra.mxu0 %v4268_v38  ;;  %v4326_v22 = vld [vmem:[#allocation2 + $0x484] ss:$16 sps:$4 sm:$0xff]   ;;  %v4324_v24 = vld [vmem:[#allocation2 + $0x480] ss:$16 sps:$4 sm:$0xff]  }
  0x75   :  { %1386 = vmatpush2.bf16.msra.mxu1 %v4269_v39  ;;  %1346 = vmatprep.subr.bf16.mxu0 %v4270_v40  ;;  %v4332_v26 = vld [vmem:[#allocation2 + $0x464] ss:$16 sps:$4 sm:$0xff]   ;;  %v4330_v28 = vld [vmem:[#allocation2 + $0x460] ss:$16 sps:$4 sm:$0xff]   ;;  %v4347_v39 = vld [vmem:[#allocation2 + $0x4c] ss:$16 sps:$4 sm:$0xff]  }
  0x76   :  { %1387 = vmatprep.subr.bf16.mxu1 %v4272_v41  ;;  %v4338_v30 = vld [vmem:[#allocation2 + $0x444] ss:$16 sps:$4 sm:$0xff]   ;;  %v4336_v32 = vld [vmem:[#allocation2 + $0x440] ss:$16 sps:$4 sm:$0xff]   ;;  %v4345_v41 = vld [vmem:[#allocation2 + $0x48] ss:$16 sps:$4 sm:$0xff]  }
  0x77   :  { %v4344_v34 = vld [vmem:[#allocation2 + $0x424] ss:$16 sps:$4 sm:$0xff]   ;;  %v4342_v38 = vld [vmem:[#allocation2 + $0x420] ss:$16 sps:$4 sm:$0xff]  }
  0x78   :  { %1347 = vmatpush2.bf16.msra.mxu0 %v4274_v42  ;;  %v4350_v40 = vld [vmem:[#allocation2 + $0x404] ss:$16 sps:$4 sm:$0xff]   ;;  %v4348_v42 = vld [vmem:[#allocation2 + $0x400] ss:$16 sps:$4 sm:$0xff]  }
  0x79   :  { %1388 = vmatpush2.bf16.msra.mxu1 %v4275_v43  ;;  %1348 = vmatprep.subr.bf16.mxu0 %v4276_v44  ;;  %v4353_v43 = vld [vmem:[#allocation2 + $0x2c] ss:$16 sps:$4 sm:$0xff]   ;;  %v4356_v44 = vld [vmem:[#allocation2 + $0x5e4] ss:$16 sps:$4 sm:$0xff]   ;;  %v4354_v46 = vld [vmem:[#allocation2 + $0x5e0] ss:$16 sps:$4 sm:$0xff]  }
  0x7a   :  { %1389 = vmatprep.subr.bf16.mxu1 %v4278_v45  ;;  %v4351_v45 = vld [vmem:[#allocation2 + $0x28] ss:$16 sps:$4 sm:$0xff]   ;;  %v4360_v50 = vld [vmem:[#allocation2 + $0x5c0] ss:$16 sps:$4 sm:$0xff]   ;;  %v4392_v5 = vld [vmem:[#allocation2 + $0x524] ss:$16 sps:$4 sm:$0xff]  }
  0x7b   :  { %v114_v15 = vld [vmem:[%s5217_s0 + $0x20] sm:$0xff] }
  0x7c   :  { %1349 = vmatpush2.bf16.msra.mxu0 %v4280_v47  ;;  %v4359_v47 = vld [vmem:[#allocation2 + $0xc] ss:$16 sps:$4 sm:$0xff]  }
  0x7d   :  { %1390 = vmatpush2.bf16.msra.mxu1 %v4281_v48  ;;  %1350 = vmatprep.subr.bf16.mxu0 %v4282_v51  ;;  %v4362_v48 = vld [vmem:[#allocation2 + $0x5c4] ss:$16 sps:$4 sm:$0xff]   ;;  %v4365_v51 = vld [vmem:[#allocation2 + $0x1ec] ss:$16 sps:$4 sm:$0xff]  }
  0x7e   :  { %1391 = vmatprep.subr.bf16.mxu1 %v4284_v53  ;;  %v4368_v53 = vld [vmem:[#allocation2 + $0x5a4] ss:$16 sps:$4 sm:$0xff]  }
  0x80   :  { %1351 = vmatpush2.bf16.msra.mxu0 %v4286_v54  ;;  %v4363_v54 = vld [vmem:[#allocation2 + $0x1e8] ss:$16 sps:$4 sm:$0xff]  }
  0x81   :  { %1392 = vmatpush2.bf16.msra.mxu1 %v4287_v55  ;;  %1352 = vmatprep.subr.bf16.mxu0 %v4288_v56  ;;  %v4366_v55 = vld [vmem:[#allocation2 + $0x5a0] ss:$16 sps:$4 sm:$0xff]   ;;  %v4371_v56 = vld [vmem:[#allocation2 + $0x1cc] ss:$16 sps:$4 sm:$0xff]  }
  0x82   :  { %1393 = vmatprep.subr.bf16.mxu1 %v4290_v57  ;;  %v4374_v57 = vld [vmem:[#allocation2 + $0x584] ss:$16 sps:$4 sm:$0xff]  }
  0x84   :  { %1353 = vmatpush2.bf16.msra.mxu0 %v4292_v58  ;;  %v4369_v58 = vld [vmem:[#allocation2 + $0x1c8] ss:$16 sps:$4 sm:$0xff]  }
  0x85   :  { %1394 = vmatpush2.bf16.msra.mxu1 %v4293_v59  ;;  %1354 = vmatprep.subr.bf16.mxu0 %v4294_v60  ;;  %v4372_v59 = vld [vmem:[#allocation2 + $0x580] ss:$16 sps:$4 sm:$0xff]   ;;  %v4377_v60 = vld [vmem:[#allocation2 + $0x1ac] ss:$16 sps:$4 sm:$0xff]  }
  0x86   :  { %1395 = vmatprep.subr.bf16.mxu1 %v4296_v61  ;;  %v4380_v61 = vld [vmem:[#allocation2 + $0x564] ss:$16 sps:$4 sm:$0xff]  }
  0x88   :  { %1355 = vmatpush2.bf16.msra.mxu0 %v4298_v62  ;;  %v4375_v62 = vld [vmem:[#allocation2 + $0x1a8] ss:$16 sps:$4 sm:$0xff]  }
  0x89   :  { %1396 = vmatpush2.bf16.msra.mxu1 %v4299_v63  ;;  %1356 = vmatprep.subr.bf16.mxu0 %v4300_v0  ;;  %v4378_v63 = vld [vmem:[#allocation2 + $0x560] ss:$16 sps:$4 sm:$0xff]   ;;  %v4383_v0 = vld [vmem:[#allocation2 + $0x18c] ss:$16 sps:$4 sm:$0xff]  }
  0x8a   :  { %1397 = vmatprep.subr.bf16.mxu1 %v4302_v1  ;;  %v4386_v1 = vld [vmem:[#allocation2 + $0x544] ss:$16 sps:$4 sm:$0xff]  }
  0x8c   :  { %1357 = vmatpush2.bf16.msra.mxu0 %v4304_v2  ;;  %v4381_v2 = vld [vmem:[#allocation2 + $0x188] ss:$16 sps:$4 sm:$0xff]  }
  0x8d   :  { %1398 = vmatpush2.bf16.msra.mxu1 %v4305_v3  ;;  %1408 = vmatprep.subr.bf16.mxu0 %v4308_v6  ;;  %v4384_v3 = vld [vmem:[#allocation2 + $0x540] ss:$16 sps:$4 sm:$0xff]   ;;  %v4387_v6 = vld [vmem:[#allocation2 + $0x168] ss:$16 sps:$4 sm:$0xff]  }
  0x8e   :  { %1463 = vmatprep.subr.bf16.mxu1 %v4311_v7  ;;  %v4390_v7 = vld [vmem:[#allocation2 + $0x520] ss:$16 sps:$4 sm:$0xff]  }
  0x8f   :  { %1359 = vmatmul.mubr.bf16.vlgmr.msra.gmra.mxu0 %v5024_v8 }
  0x90   :  { %1400 = vmatmul.mubr.bf16.vlgmr.msra.gmra.mxu1 %v5026_v9  ;;  %1409 = vmatpush1.bf16.msra.mxu0 %v4306_v10  ;;  %v4395_v10 = vld [vmem:[#allocation2 + $0x14c] ss:$16 sps:$4 sm:$0xff]  }
  0x91   :  { %1464 = vmatpush1.bf16.msra.mxu1 %v4309_v11  ;;  %1410 = vmatprep.subr.bf16.mxu0 %v4314_v12  ;;  %v4398_v11 = vld [vmem:[#allocation2 + $0x504] ss:$16 sps:$4 sm:$0xff]   ;;  %v4393_v12 = vld [vmem:[#allocation2 + $0x148] ss:$16 sps:$4 sm:$0xff]  }
  0x92   :  { %1481 = vmatprep.mubr.bf16.mxu1 %v4934_v16  ;;  %1490 = vmatprep.subr.bf16.mxu1 %v4317_v13  ;;  %v4396_v13 = vld [vmem:[#allocation2 + $0x500] ss:$16 sps:$4 sm:$0xff]  }
  0x93   :  { %1440 = vmatprep.mubr.bf16.mxu0 %v5042_v36 }
  0x94   :  { %1411 = vmatpush1.bf16.msra.mxu0 %v4312_v14  ;;  %v4401_v14 = vld [vmem:[#allocation2 + $0x12c] ss:$16 sps:$4 sm:$0xff]  }
  0x95   :  { %1412 = vmatprep.subr.bf16.mxu0 %v4320_v17  ;;  %v4404_v17 = vld [vmem:[#allocation2 + $0x2ec] ss:$16 sps:$4 sm:$0xff]  }
  0x98   :  { %3822 = vmatmul.mubr.msk.bf16.vlgmr.msra.gmra.mxu1 %vm1322_vm0, %v5034_v19  ;;  %1413 = vmatpush1.bf16.msra.mxu0 %v4318_v20  ;;  %v5048_v20 = vpack.c.bf16 %v114_v15, %v114_v15  ;;  %v4491_v15 = vld [vmem:[#allocation2 + $0x54c] ss:$16 sps:$4 sm:$0xff]  }
  0x99   :  { %1491 = vmatpush1.bf16.msra.mxu1 %v4315_v18  ;;  %1414 = vmatprep.subr.bf16.mxu0 %v4326_v22  ;;  %v4399_v18 = vld [vmem:[#allocation2 + $0x128] ss:$16 sps:$4 sm:$0xff]   ;;  %v4407_v22 = vld [vmem:[#allocation2 + $0x10c] ss:$16 sps:$4 sm:$0xff]  }
  0x9a   :  { %1492 = vmatprep.subr.bf16.mxu1 %v4323_v21  ;;  %1522 = vmatprep.mubr.bf16.mxu1 %v5009_v49  ;;  %v4357_v49 = vld [vmem:[#allocation2 + $0x8] ss:$16 sps:$4 sm:$0xff]  }
  0x9b   :  { %v4402_v21 = vld [vmem:[#allocation2 + $0x2e8] ss:$16 sps:$4 sm:$0xff]  }
  0x9c   :  { %1415 = vmatpush1.bf16.msra.mxu0 %v4324_v24  ;;  %v4405_v24 = vld [vmem:[#allocation2 + $0x108] ss:$16 sps:$4 sm:$0xff]  }
  0x9d   :  { %1493 = vmatpush1.bf16.msra.mxu1 %v4321_v23  ;;  %1416 = vmatprep.subr.bf16.mxu0 %v4332_v26  ;;  %v4410_v23 = vld [vmem:[#allocation2 + $0x2cc] ss:$16 sps:$4 sm:$0xff]  }
  0x9e   :  { %1494 = vmatprep.subr.bf16.mxu1 %v4329_v25  ;;  %v4408_v25 = vld [vmem:[#allocation2 + $0x2c8] ss:$16 sps:$4 sm:$0xff]   ;;  %v4413_v26 = vld [vmem:[#allocation2 + $0x4ec] ss:$16 sps:$4 sm:$0xff]  }
  0xa0   :  { %1417 = vmatpush1.bf16.msra.mxu0 %v4330_v28  ;;  %v4411_v28 = vld [vmem:[#allocation2 + $0x4e8] ss:$16 sps:$4 sm:$0xff]  }
  0xa1   :  { %1495 = vmatpush1.bf16.msra.mxu1 %v4327_v27  ;;  %1418 = vmatprep.subr.bf16.mxu0 %v4338_v30  ;;  %v4416_v27 = vld [vmem:[#allocation2 + $0x2ac] ss:$16 sps:$4 sm:$0xff]  }
  0xa2   :  { %1496 = vmatprep.subr.bf16.mxu1 %v4335_v29  ;;  %v4414_v29 = vld [vmem:[#allocation2 + $0x2a8] ss:$16 sps:$4 sm:$0xff]   ;;  %v4419_v30 = vld [vmem:[#allocation2 + $0x4cc] ss:$16 sps:$4 sm:$0xff]  }
  0xa4   :  { %1419 = vmatpush1.bf16.msra.mxu0 %v4336_v32  ;;  %v4417_v32 = vld [vmem:[#allocation2 + $0x4c8] ss:$16 sps:$4 sm:$0xff]  }
  0xa5   :  { %1497 = vmatpush1.bf16.msra.mxu1 %v4333_v31  ;;  %1420 = vmatprep.subr.bf16.mxu0 %v4344_v34  ;;  %v4422_v31 = vld [vmem:[#allocation2 + $0x28c] ss:$16 sps:$4 sm:$0xff]  }
  0xa6   :  { %1498 = vmatprep.subr.bf16.mxu1 %v4341_v33  ;;  %v4420_v33 = vld [vmem:[#allocation2 + $0x288] ss:$16 sps:$4 sm:$0xff]   ;;  %v4425_v34 = vld [vmem:[#allocation2 + $0x4ac] ss:$16 sps:$4 sm:$0xff]  }
  0xa8   :  { %1421 = vmatpush1.bf16.msra.mxu0 %v4342_v38  ;;  %v4426_v38 = vld [vmem:[#allocation2 + $0x268] ss:$16 sps:$4 sm:$0xff]  }
  0xa9   :  { %1499 = vmatpush1.bf16.msra.mxu1 %v4339_v37  ;;  %1422 = vmatprep.subr.bf16.mxu0 %v4350_v40  ;;  %v4423_v37 = vld [vmem:[#allocation2 + $0x4a8] ss:$16 sps:$4 sm:$0xff]  }
  0xaa   :  { %1500 = vmatprep.subr.bf16.mxu1 %v4347_v39  ;;  %v4434_v39 = vld [vmem:[#allocation2 + $0x24c] ss:$16 sps:$4 sm:$0xff]   ;;  %v4429_v40 = vld [vmem:[#allocation2 + $0x488] ss:$16 sps:$4 sm:$0xff]  }
  0xac   :  { %1423 = vmatpush1.bf16.msra.mxu0 %v4348_v42  ;;  %v4440_v42 = vld [vmem:[#allocation2 + $0x22c] ss:$16 sps:$4 sm:$0xff]  }
  0xad   :  { %1501 = vmatpush1.bf16.msra.mxu1 %v4345_v41  ;;  %1424 = vmatprep.subr.bf16.mxu0 %v4356_v44  ;;  %v4437_v41 = vld [vmem:[#allocation2 + $0x46c] ss:$16 sps:$4 sm:$0xff]   ;;  %v4438_v44 = vld [vmem:[#allocation2 + $0x228] ss:$16 sps:$4 sm:$0xff]  }
  0xae   :  { %1502 = vmatprep.subr.bf16.mxu1 %v4353_v43  ;;  %v4435_v43 = vld [vmem:[#allocation2 + $0x468] ss:$16 sps:$4 sm:$0xff]  }
  0xb0   :  { %1425 = vmatpush2.bf16.msra.mxu0 %v4354_v46  ;;  %v4441_v46 = vld [vmem:[#allocation2 + $0x448] ss:$16 sps:$4 sm:$0xff]  }
  0xb1   :  { %1503 = vmatpush1.bf16.msra.mxu1 %v4351_v45  ;;  %1426 = vmatprep.subr.bf16.mxu0 %v4362_v48  ;;  %v4446_v45 = vld [vmem:[#allocation2 + $0x20c] ss:$16 sps:$4 sm:$0xff]  }
  0xb2   :  { %1504 = vmatprep.subr.bf16.mxu1 %v4359_v47  ;;  %v4444_v47 = vld [vmem:[#allocation2 + $0x208] ss:$16 sps:$4 sm:$0xff]   ;;  %v4449_v48 = vld [vmem:[#allocation2 + $0x42c] ss:$16 sps:$4 sm:$0xff]  }
  0xb4   :  { %1427 = vmatpush2.bf16.msra.mxu0 %v4360_v50  ;;  %v4447_v50 = vld [vmem:[#allocation2 + $0x428] ss:$16 sps:$4 sm:$0xff]  }
  0xb5   :  { %1505 = vmatpush1.bf16.msra.mxu1 %v4357_v49  ;;  %1428 = vmatprep.subr.bf16.mxu0 %v4368_v53  ;;  %v4452_v49 = vld [vmem:[#allocation2 + $0x3ec] ss:$16 sps:$4 sm:$0xff]  }
  0xb6   :  { %1506 = vmatprep.subr.bf16.mxu1 %v4365_v51  ;;  %v4450_v51 = vld [vmem:[#allocation2 + $0x3e8] ss:$16 sps:$4 sm:$0xff]   ;;  %v4455_v53 = vld [vmem:[#allocation2 + $0x40c] ss:$16 sps:$4 sm:$0xff]  }
  0xb8   :  { %1429 = vmatpush2.bf16.msra.mxu0 %v4366_v55  ;;  %v4453_v55 = vld [vmem:[#allocation2 + $0x408] ss:$16 sps:$4 sm:$0xff]  }
  0xb9   :  { %1507 = vmatpush2.bf16.msra.mxu1 %v4363_v54  ;;  %1430 = vmatprep.subr.bf16.mxu0 %v4374_v57  ;;  %v4458_v54 = vld [vmem:[#allocation2 + $0x3cc] ss:$16 sps:$4 sm:$0xff]  }
  0xba   :  { %1508 = vmatprep.subr.bf16.mxu1 %v4371_v56  ;;  %v4456_v56 = vld [vmem:[#allocation2 + $0x3c8] ss:$16 sps:$4 sm:$0xff]   ;;  %v4461_v57 = vld [vmem:[#allocation2 + $0x5ec] ss:$16 sps:$4 sm:$0xff]  }
  0xbc   :  { %1431 = vmatpush2.bf16.msra.mxu0 %v4372_v59  ;;  %v4459_v59 = vld [vmem:[#allocation2 + $0x5e8] ss:$16 sps:$4 sm:$0xff]  }
  0xbd   :  { %1509 = vmatpush2.bf16.msra.mxu1 %v4369_v58  ;;  %1432 = vmatprep.subr.bf16.mxu0 %v4380_v61  ;;  %v4464_v58 = vld [vmem:[#allocation2 + $0x3ac] ss:$16 sps:$4 sm:$0xff]  }
  0xbe   :  { %1510 = vmatprep.subr.bf16.mxu1 %v4377_v60  ;;  %v4462_v60 = vld [vmem:[#allocation2 + $0x3a8] ss:$16 sps:$4 sm:$0xff]   ;;  %v4467_v61 = vld [vmem:[#allocation2 + $0x5cc] ss:$16 sps:$4 sm:$0xff]  }
  0xc0   :  { %1433 = vmatpush2.bf16.msra.mxu0 %v4378_v63  ;;  %v4465_v63 = vld [vmem:[#allocation2 + $0x5c8] ss:$16 sps:$4 sm:$0xff]  }
  0xc1   :  { %1511 = vmatpush2.bf16.msra.mxu1 %v4375_v62  ;;  %1434 = vmatprep.subr.bf16.mxu0 %v4386_v1  ;;  %v4470_v62 = vld [vmem:[#allocation2 + $0x38c] ss:$16 sps:$4 sm:$0xff]  }
  0xc2   :  { %1512 = vmatprep.subr.bf16.mxu1 %v4383_v0  ;;  %v4468_v0 = vld [vmem:[#allocation2 + $0x388] ss:$16 sps:$4 sm:$0xff]   ;;  %v4473_v1 = vld [vmem:[#allocation2 + $0x5ac] ss:$16 sps:$4 sm:$0xff]  }
  0xc4   :  { %1435 = vmatpush2.bf16.msra.mxu0 %v4384_v3  ;;  %v4471_v3 = vld [vmem:[#allocation2 + $0x5a8] ss:$16 sps:$4 sm:$0xff]  }
  0xc5   :  { %1513 = vmatpush2.bf16.msra.mxu1 %v4381_v2  ;;  %1436 = vmatprep.subr.bf16.mxu0 %v4392_v5  ;;  %v4476_v2 = vld [vmem:[#allocation2 + $0x36c] ss:$16 sps:$4 sm:$0xff]  }
  0xc6   :  { %1514 = vmatprep.subr.bf16.mxu1 %v4389_v4  ;;  %v4474_v4 = vld [vmem:[#allocation2 + $0x368] ss:$16 sps:$4 sm:$0xff]   ;;  %v4479_v5 = vld [vmem:[#allocation2 + $0x58c] ss:$16 sps:$4 sm:$0xff]  }
  0xc8   :  { %1437 = vmatpush2.bf16.msra.mxu0 %v4390_v7  ;;  %v4477_v7 = vld [vmem:[#allocation2 + $0x588] ss:$16 sps:$4 sm:$0xff]  }
  0xc9   :  { %1515 = vmatpush2.bf16.msra.mxu1 %v4387_v6  ;;  %1438 = vmatprep.subr.bf16.mxu0 %v4398_v11  ;;  %v4482_v6 = vld [vmem:[#allocation2 + $0x34c] ss:$16 sps:$4 sm:$0xff]  }
  0xca   :  { %1516 = vmatprep.subr.bf16.mxu1 %v4395_v10  ;;  %v4480_v10 = vld [vmem:[#allocation2 + $0x348] ss:$16 sps:$4 sm:$0xff]   ;;  %v4485_v11 = vld [vmem:[#allocation2 + $0x56c] ss:$16 sps:$4 sm:$0xff]  }
  0xcc   :  { %1439 = vmatpush2.bf16.msra.mxu0 %v4396_v13  ;;  %v4483_v13 = vld [vmem:[#allocation2 + $0x568] ss:$16 sps:$4 sm:$0xff]  }
  0xcd   :  { %1517 = vmatpush2.bf16.msra.mxu1 %v4393_v12  ;;  %1531 = vmatprep.subr.bf16.mxu0 %v4404_v17  ;;  %v4488_v12 = vld [vmem:[#allocation2 + $0x32c] ss:$16 sps:$4 sm:$0xff]  }
  0xce   :  { %1518 = vmatprep.subr.bf16.mxu1 %v4401_v14  ;;  %v4486_v14 = vld [vmem:[#allocation2 + $0x328] ss:$16 sps:$4 sm:$0xff]   ;;  %v4494_v17 = vld [vmem:[#allocation2 + $0x30c] ss:$16 sps:$4 sm:$0xff]  }
  0xcf   :  { %1441 = vmatmul.mubr.bf16.vlgmr.msra.gmra.mxu0 %v5048_v20 }
  0xd0   :  { %1532 = vmatpush1.bf16.msra.mxu0 %v4402_v21  ;;  %1563 = vmatprep.mubr.bf16.mxu0 %v5014_v52  ;;  %v4431_v52 = vld [vmem:[#allocation2 + $0x48c] ss:$16 sps:$4 sm:$0xff]   ;;  %v4492_v21 = vld [vmem:[#allocation2 + $0x308] ss:$16 sps:$4 sm:$0xff]  }
  0xd1   :  { %1519 = vmatpush2.bf16.msra.mxu1 %v4399_v18  ;;  %1533 = vmatprep.subr.bf16.mxu0 %v4410_v23  ;;  %v4489_v18 = vld [vmem:[#allocation2 + $0x548] ss:$16 sps:$4 sm:$0xff]  }
  0xd2   :  { %1520 = vmatprep.subr.bf16.mxu1 %v4407_v22  ;;  %v4497_v22 = vld [vmem:[#allocation2 + $0x52c] ss:$16 sps:$4 sm:$0xff]  }
  0xd3   :  { %v4506_v23 = vld [vmem:[#allocation4 + $0xac] ss:$12 sps:$4 sm:$0xff]  }
  0xd4   :  { %1534 = vmatpush1.bf16.msra.mxu0 %v4408_v25  ;;  %v4504_v25 = vld [vmem:[#allocation4 + $0xa8] ss:$12 sps:$4 sm:$0xff]  }
  0xd5   :  { %1521 = vmatpush2.bf16.msra.mxu1 %v4405_v24  ;;  %1535 = vmatprep.subr.bf16.mxu0 %v4416_v27  ;;  %v4495_v24 = vld [vmem:[#allocation2 + $0x528] ss:$16 sps:$4 sm:$0xff]   ;;  %v4509_v27 = vld [vmem:[#allocation4 + $0x94] ss:$12 sps:$4 sm:$0xff]  }
  0xd6   :  { %1572 = vmatprep.subr.bf16.mxu1 %v4413_v26  ;;  %v4500_v26 = vld [vmem:[#allocation2 + $0x50c] ss:$16 sps:$4 sm:$0xff]  }
  0xd8   :  { %1523 = vmatmul.mubr.bf16.vlgmr.msra.gmra.mxu1 %v5024_v8  ;;  %1536 = vmatpush1.bf16.msra.mxu0 %v4414_v29  ;;  %v4432_v8 = vld [vmem:[#allocation2 + $0x248] ss:$16 sps:$4 sm:$0xff]   ;;  %v4507_v29 = vld [vmem:[#allocation4 + $0x90] ss:$12 sps:$4 sm:$0xff]  }
  0xd9   :  { %1573 = vmatpush1.bf16.msra.mxu1 %v4411_v28  ;;  %1537 = vmatprep.subr.bf16.mxu0 %v4422_v31  ;;  %v4498_v28 = vld [vmem:[#allocation2 + $0x508] ss:$16 sps:$4 sm:$0xff]  }
  0xda   :  { %1574 = vmatprep.subr.bf16.mxu1 %v4419_v30  ;;  %1604 = vmatprep.mubr.bf16.mxu1 %v5042_v36  ;;  %v4443_v36 = vld [vmem:[#allocation2 + $0x44c] ss:$16 sps:$4 sm:$0xff]  }
  0xdb   :  { %v4503_v30 = vld [vmem:[#allocation2 + $0x60c] ss:$16 sps:$4 sm:$0xff]  }
  0xdc   :  { %1538 = vmatpush1.bf16.msra.mxu0 %v4420_v33  ;;  %v4512_v31 = vld [vmem:[#allocation4 + $0x7c] ss:$12 sps:$4 sm:$0xff]   ;;  %v4510_v33 = vld [vmem:[#allocation4 + $0x78] ss:$12 sps:$4 sm:$0xff]  }
  0xdd   :  { %1575 = vmatpush1.bf16.msra.mxu1 %v4417_v32  ;;  %1539 = vmatprep.subr.bf16.mxu0 %v4428_v35  ;;  %v4501_v32 = vld [vmem:[#allocation2 + $0x608] ss:$16 sps:$4 sm:$0xff]  }
  0xde   :  { %1576 = vmatprep.subr.bf16.mxu1 %v4425_v34  ;;  %v4515_v34 = vld [vmem:[#allocation4 + $0x64] ss:$12 sps:$4 sm:$0xff]   ;;  %v4518_v35 = vld [vmem:[#allocation4 + $0x4c] ss:$12 sps:$4 sm:$0xff]  }
  0xe0   :  { %1540 = vmatpush1.bf16.msra.mxu0 %v4426_v38  ;;  %v4521_v38 = vld [vmem:[#allocation4 + $0x34] ss:$12 sps:$4 sm:$0xff]  }
  0xe1   :  { %1577 = vmatpush1.bf16.msra.mxu1 %v4423_v37  ;;  %1541 = vmatprep.subr.bf16.mxu0 %v4434_v39  ;;  %v4516_v37 = vld [vmem:[#allocation4 + $0x48] ss:$12 sps:$4 sm:$0xff]  }
  0xe2   :  { %1578 = vmatprep.subr.bf16.mxu1 %v4431_v52  ;;  %v4519_v52 = vld [vmem:[#allocation4 + $0x30] ss:$12 sps:$4 sm:$0xff]  }
  0xe3   :  { %v4524_v39 = vld [vmem:[#allocation4 + $0x1c] ss:$12 sps:$4 sm:$0xff]  }
  0xe4   :  { %1542 = vmatpush1.bf16.msra.mxu0 %v4432_v8  ;;  %v4559_v8 = vld [vmem:[#allocation4 + $0x228] ss:$12 sps:$4 sm:$0xff]  }
  0xe5   :  { %1579 = vmatpush1.bf16.msra.mxu1 %v4429_v40  ;;  %1543 = vmatprep.subr.bf16.mxu0 %v4440_v42  ;;  %v4522_v40 = vld [vmem:[#allocation4 + $0x18] ss:$12 sps:$4 sm:$0xff]   ;;  %v4525_v42 = vld [vmem:[#allocation4] ss:$12 sps:$4 sm:$0xff]  }
  0xe6   :  { %1580 = vmatprep.subr.bf16.mxu1 %v4437_v41  ;;  %v4561_v41 = vld [vmem:[#allocation4 + $0x22c] ss:$12 sps:$4 sm:$0xff]  }
  0xe8   :  { %1544 = vmatpush1.bf16.msra.mxu0 %v4438_v44  ;;  %v4564_v44 = vld [vmem:[#allocation4 + $0x210] ss:$12 sps:$4 sm:$0xff]  }
  0xe9   :  { %1581 = vmatpush1.bf16.msra.mxu1 %v4435_v43  ;;  %1545 = vmatprep.subr.bf16.mxu0 %v4446_v45  ;;  %v4530_v43 = vld [vmem:[#allocation4 + $0x16c] ss:$12 sps:$4 sm:$0xff]   ;;  %v4533_v45 = vld [vmem:[#allocation4 + $0x154] ss:$12 sps:$4 sm:$0xff]  }
  0xea   :  { %1582 = vmatprep.subr.bf16.mxu1 %v4443_v36  ;;  %v4566_v36 = vld [vmem:[#allocation4 + $0x214] ss:$12 sps:$4 sm:$0xff]  }
  0xec   :  { %1546 = vmatpush1.bf16.msra.mxu0 %v4444_v47  ;;  %v4571_v47 = vld [vmem:[#allocation4 + $0x1fc] ss:$12 sps:$4 sm:$0xff]  }
  0xed   :  { %1583 = vmatpush1.bf16.msra.mxu1 %v4441_v46  ;;  %1547 = vmatprep.subr.bf16.mxu0 %v4452_v49  ;;  %v4569_v46 = vld [vmem:[#allocation4 + $0x1f8] ss:$12 sps:$4 sm:$0xff]   ;;  %v4536_v49 = vld [vmem:[#allocation4 + $0x13c] ss:$12 sps:$4 sm:$0xff]  }
  0xee   :  { %1584 = vmatprep.subr.bf16.mxu1 %v4449_v48  ;;  %v4531_v48 = vld [vmem:[#allocation4 + $0x150] ss:$12 sps:$4 sm:$0xff]  }
  0xf0   :  { %1548 = vmatpush2.bf16.msra.mxu0 %v4450_v51  ;;  %v4576_v51 = vld [vmem:[#allocation4 + $0x1e4] ss:$12 sps:$4 sm:$0xff]  }
  0xf1   :  { %1585 = vmatpush1.bf16.msra.mxu1 %v4447_v50  ;;  %1549 = vmatprep.subr.bf16.mxu0 %v4458_v54  ;;  %v4574_v50 = vld [vmem:[#allocation4 + $0x1e0] ss:$12 sps:$4 sm:$0xff]   ;;  %v4539_v54 = vld [vmem:[#allocation4 + $0x124] ss:$12 sps:$4 sm:$0xff]  }
  0xf2   :  { %1586 = vmatprep.subr.bf16.mxu1 %v4455_v53  ;;  %v4534_v53 = vld [vmem:[#allocation4 + $0x138] ss:$12 sps:$4 sm:$0xff]  }
  0xf4   :  { %1550 = vmatpush2.bf16.msra.mxu0 %v4456_v56  ;;  %v4581_v56 = vld [vmem:[#allocation4 + $0x1cc] ss:$12 sps:$4 sm:$0xff]  }
  0xf5   :  { %1587 = vmatpush1.bf16.msra.mxu1 %v4453_v55  ;;  %1551 = vmatprep.subr.bf16.mxu0 %v4464_v58  ;;  %v4579_v55 = vld [vmem:[#allocation4 + $0x1c8] ss:$12 sps:$4 sm:$0xff]   ;;  %v4542_v58 = vld [vmem:[#allocation4 + $0x10c] ss:$12 sps:$4 sm:$0xff]  }
  0xf6   :  { %1588 = vmatprep.subr.bf16.mxu1 %v4461_v57  ;;  %v4537_v57 = vld [vmem:[#allocation4 + $0x120] ss:$12 sps:$4 sm:$0xff]  }
  0xf8   :  { %1552 = vmatpush2.bf16.msra.mxu0 %v4462_v60  ;;  %v4583_v60 = vld [vmem:[#allocation4 + $0x1b0] ss:$12 sps:$4 sm:$0xff]  }
  0xf9   :  { %1589 = vmatpush2.bf16.msra.mxu1 %v4459_v59  ;;  %1553 = vmatprep.subr.bf16.mxu0 %v4470_v62  ;;  %v4585_v59 = vld [vmem:[#allocation4 + $0x1b4] ss:$12 sps:$4 sm:$0xff]  }
  0xfa   :  { %1590 = vmatprep.subr.bf16.mxu1 %v4467_v61  ;;  %v4588_v61 = vld [vmem:[#allocation4 + $0x19c] ss:$12 sps:$4 sm:$0xff]  }
  0xfb   :  { %v4540_v62 = vld [vmem:[#allocation4 + $0x108] ss:$12 sps:$4 sm:$0xff]  }
  0xfc   :  { %1554 = vmatpush2.bf16.msra.mxu0 %v4468_v0  ;;  %v4586_v0 = vld [vmem:[#allocation4 + $0x198] ss:$12 sps:$4 sm:$0xff]  }
  0xfd   :  { %1591 = vmatpush2.bf16.msra.mxu1 %v4465_v63  ;;  %1555 = vmatprep.subr.bf16.mxu0 %v4476_v2  ;;  %v4545_v63 = vld [vmem:[#allocation4 + $0xf4] ss:$12 sps:$4 sm:$0xff]   ;;  %v4543_v2 = vld [vmem:[#allocation4 + $0xf0] ss:$12 sps:$4 sm:$0xff]  }
  0xfe   :  { %1592 = vmatprep.subr.bf16.mxu1 %v4473_v1  ;;  %v4591_v1 = vld [vmem:[#allocation4 + $0x184] ss:$12 sps:$4 sm:$0xff]  }
 0x100   :  { %1556 = vmatpush2.bf16.msra.mxu0 %v4474_v4  ;;  %v4548_v4 = vld [vmem:[#allocation4 + $0xdc] ss:$12 sps:$4 sm:$0xff]  }
 0x101   :  { %1593 = vmatpush2.bf16.msra.mxu1 %v4471_v3  ;;  %1557 = vmatprep.subr.bf16.mxu0 %v4482_v6  ;;  %v4589_v3 = vld [vmem:[#allocation4 + $0x180] ss:$12 sps:$4 sm:$0xff]   ;;  %v4546_v6 = vld [vmem:[#allocation4 + $0xd8] ss:$12 sps:$4 sm:$0xff]  }
 0x102   :  { %1594 = vmatprep.subr.bf16.mxu1 %v4479_v5  ;;  %v4594_v5 = vld [vmem:[#allocation4 + $0x2ec] ss:$12 sps:$4 sm:$0xff]  }
 0x104   :  { %1558 = vmatpush2.bf16.msra.mxu0 %v4480_v10  ;;  %v4551_v10 = vld [vmem:[#allocation4 + $0xc4] ss:$12 sps:$4 sm:$0xff]  }
 0x105   :  { %1595 = vmatpush2.bf16.msra.mxu1 %v4477_v7  ;;  %1559 = vmatprep.subr.bf16.mxu0 %v4488_v12  ;;  %v4592_v7 = vld [vmem:[#allocation4 + $0x2e8] ss:$12 sps:$4 sm:$0xff]   ;;  %v4549_v12 = vld [vmem:[#allocation4 + $0xc0] ss:$12 sps:$4 sm:$0xff]  }
 0x106   :  { %1596 = vmatprep.subr.bf16.mxu1 %v4485_v11  ;;  %v4597_v11 = vld [vmem:[#allocation4 + $0x2d4] ss:$12 sps:$4 sm:$0xff]  }
 0x108   :  { %1560 = vmatpush2.bf16.msra.mxu0 %v4486_v14  ;;  %v4552_v14 = vld [vmem:[#allocation4 + $0x170] ss:$12 sps:$4 sm:$0xff]  }
 0x109   :  { %1597 = vmatpush2.bf16.msra.mxu1 %v4483_v13  ;;  %1561 = vmatprep.subr.bf16.mxu0 %v4494_v17  ;;  %v4595_v13 = vld [vmem:[#allocation4 + $0x2d0] ss:$12 sps:$4 sm:$0xff]  }
 0x10a   :  { %1598 = vmatprep.subr.bf16.mxu1 %v4491_v15  ;;  %v4600_v15 = vld [vmem:[#allocation4 + $0x2bc] ss:$12 sps:$4 sm:$0xff]  }
 0x10c   :  { %1562 = vmatpush2.bf16.msra.mxu0 %v4492_v21  ;;  %v4598_v21 = vld [vmem:[#allocation4 + $0x2b8] ss:$12 sps:$4 sm:$0xff]  }
 0x10d   :  { %1599 = vmatpush2.bf16.msra.mxu1 %v4489_v18  ;;  %2320 = vmatprep.subr.bf16.mxu0 %v4506_v23 }
 0x10e   :  { %1600 = vmatprep.subr.bf16.mxu1 %v4497_v22 }
 0x10f   :  { %1564 = vmatmul.mubr.bf16.vlgmr.msra.gmra.mxu0 %v5026_v9  ;;  %v4513_v9 = vld [vmem:[#allocation4 + $0x60] ss:$12 sps:$4 sm:$0xff]  }
 0x110   :  { %2321 = vmatpush1.bf16.msra.mxu0 %v4504_v25  ;;  %v4603_v25 = vld [vmem:[#allocation4 + $0x2a4] ss:$12 sps:$4 sm:$0xff]  }
 0x111   :  { %1601 = vmatpush2.bf16.msra.mxu1 %v4495_v24  ;;  %2322 = vmatprep.subr.bf16.mxu0 %v4509_v27  ;;  %v4601_v24 = vld [vmem:[#allocation4 + $0x2a0] ss:$12 sps:$4 sm:$0xff]  }
 0x112   :  { %1602 = vmatprep.subr.bf16.mxu1 %v4500_v26 }
 0x114   :  { %2323 = vmatpush1.bf16.msra.mxu0 %v4507_v29 }
 0x115   :  { %1603 = vmatpush2.bf16.msra.mxu1 %v4498_v28  ;;  %2324 = vmatprep.subr.bf16.mxu0 %v4512_v31 }
 0x116   :  { %1627 = vmatprep.subr.bf16.mxu1 %v4503_v30  ;;  %v4606_v30 = vld [vmem:[#allocation4 + $0x28c] ss:$12 sps:$4 sm:$0xff]  }
 0x118   :  { %1605 = vmatmul.mubr.bf16.vlgmr.msra.gmra.mxu1 %v5048_v20  ;;  %2325 = vmatpush1.bf16.msra.mxu0 %v4510_v33  ;;  %v4527_v20 = vld [vmem:[#allocation4 + $0x4] ss:$12 sps:$4 sm:$0xff]  }
 0x119   :  { %1628 = vmatpush1.bf16.msra.mxu1 %v4501_v32  ;;  %1645 = vmatprep.mubr.bf16.mxu1 %v4934_v16  ;;  %v4604_v32 = vld [vmem:[#allocation4 + $0x288] ss:$12 sps:$4 sm:$0xff]  }
 0x11a   :  { %2326 = vmatprep.subr.bf16.mxu0 %v4515_v34  ;;  %2361 = vmatprep.subr.bf16.mxu1 %v4561_v41  ;;  %v4609_v34 = vld [vmem:[#allocation4 + $0x274] ss:$12 sps:$4 sm:$0xff]  }
 0x11c   :  { %2327 = vmatpush1.bf16.msra.mxu0 %v4513_v9 }
 0x11d   :  { %2328 = vmatprep.subr.bf16.mxu0 %v4518_v35  ;;  %v4607_v35 = vld [vmem:[#allocation4 + $0x270] ss:$12 sps:$4 sm:$0xff]  }
 0x120   :  { %3823 = vmatmul.mubr.msk.bf16.vlgmr.msra.gmra.mxu1 %vm1322_vm0, %v5034_v19  ;;  %2329 = vmatpush1.bf16.msra.mxu0 %v4516_v37  ;;  %v4528_v19 = vld [vmem:[#allocation4 + $0x168] ss:$12 sps:$4 sm:$0xff]  }
 0x121   :  { %2330 = vmatprep.subr.bf16.mxu0 %v4521_v38  ;;  %2362 = vmatpush1.bf16.msra.mxu1 %v4559_v8  ;;  %v4612_v38 = vld [vmem:[#allocation4 + $0x25c] ss:$12 sps:$4 sm:$0xff]   ;;  %v322_v8 = vlaneseq }
 0x122   :  { %2363 = vmatprep.subr.bf16.mxu1 %v4566_v36 }
 0x123   :  { %v5059_v41 = vshrl.u32 %v322_v8, 7  ;;  %v4632_v8 = vld [vmem:[#allocation6 + $0x70] ss:$8 sps:$4 sm:$0xff]  }
 0x124   :  { %2331 = vmatpush1.bf16.msra.mxu0 %v4519_v52  ;;  %v4610_v52 = vld [vmem:[#allocation4 + $0x258] ss:$12 sps:$4 sm:$0xff]  }
 0x125   :  { %2332 = vmatprep.subr.bf16.mxu0 %v4524_v39  ;;  %2364 = vmatpush1.bf16.msra.mxu1 %v4564_v44  ;;  %v4615_v39 = vld [vmem:[#allocation4 + $0x244] ss:$12 sps:$4 sm:$0xff]   ;;  %v5067_v44 = vsub.s32 1, %v5059_v41 }
 0x126   :  { %2365 = vmatprep.subr.bf16.mxu1 %v4571_v47 }
 0x128   :  { %2333 = vmatpush1.bf16.msra.mxu0 %v4522_v40  ;;  %v4613_v40 = vld [vmem:[#allocation4 + $0x240] ss:$12 sps:$4 sm:$0xff]  }
 0x129   :  { %2334 = vmatprep.subr.bf16.mxu0 %v4527_v20  ;;  %2366 = vmatpush1.bf16.msra.mxu1 %v4569_v46  ;;  %v4616_v20 = vld [vmem:[#allocation4 + $0x2f0] ss:$12 sps:$4 sm:$0xff]  }
 0x12a   :  { %2367 = vmatprep.subr.bf16.mxu1 %v4576_v51 }
 0x12c   :  { %2335 = vmatpush1.bf16.msra.mxu0 %v4525_v42  ;;  %v5062_v42 = vsub.s32 0, %v5059_v41 }
 0x12d   :  { %2336 = vmatprep.subr.bf16.mxu0 %v4530_v43  ;;  %2368 = vmatpush1.bf16.msra.mxu1 %v4574_v50  ;;  %v5064_v43 = vld [vmem:[#allocation10] ss:$8 sm:$0xf] }
 0x12e   :  { %2369 = vmatprep.subr.bf16.mxu1 %v4581_v56  ;;  %v325_v36 = vrot.slane %v5064_v43, %v5062_v42 }
 0x130   :  { %2337 = vmatpush2.bf16.msra.mxu0 %v4528_v19  ;;  %v329_v19 = vrot.slane %v5064_v43, %v5067_v44 }
 0x131   :  { %2338 = vmatprep.subr.bf16.mxu0 %v4533_v45  ;;  %2370 = vmatpush1.bf16.msra.mxu1 %v4579_v55 }
 0x132   :  { %2371 = vmatprep.subr.bf16.mxu1 %v4585_v59 }
 0x134   :  { %2339 = vmatpush2.bf16.msra.mxu0 %v4531_v48 }
 0x135   :  { %2340 = vmatprep.subr.bf16.mxu0 %v4536_v49  ;;  %2372 = vmatpush1.bf16.msra.mxu1 %v4583_v60 }
 0x136   :  { %2373 = vmatprep.subr.bf16.mxu1 %v4588_v61 }
 0x138   :  { %2341 = vmatpush2.bf16.msra.mxu0 %v4534_v53 }
 0x139   :  { %2342 = vmatprep.subr.bf16.mxu0 %v4539_v54  ;;  %2374 = vmatpush1.bf16.msra.mxu1 %v4586_v0 }
 0x13a   :  { %2375 = vmatprep.subr.bf16.mxu1 %v4591_v1  ;;  %v4554_v1 = vld [vmem:[#allocation4 + $0x158] ss:$12 sps:$4 sm:$0xff]  }
 0x13c   :  { %2343 = vmatpush2.bf16.msra.mxu0 %v4537_v57 }
 0x13d   :  { %2344 = vmatprep.subr.bf16.mxu0 %v4542_v58  ;;  %2376 = vmatpush1.bf16.msra.mxu1 %v4589_v3  ;;  %v4555_v3 = vld [vmem:[#allocation4 + $0x98] ss:$12 sps:$4 sm:$0xff]  }
 0x13e   :  { %2377 = vmatprep.subr.bf16.mxu1 %v4594_v5  ;;  %v4556_v5 = vld [vmem:[#allocation4 + $0x140] ss:$12 sps:$4 sm:$0xff]  }
 0x140   :  { %2345 = vmatpush2.bf16.msra.mxu0 %v4540_v62  ;;  %v4553_v62 = vld [vmem:[#allocation4 + $0xb0] ss:$12 sps:$4 sm:$0xff]  }
 0x141   :  { %2346 = vmatprep.subr.bf16.mxu0 %v4545_v63  ;;  %2378 = vmatpush2.bf16.msra.mxu1 %v4592_v7  ;;  %v4558_v7 = vld [vmem:[#allocation4 + $0x128] ss:$12 sps:$4 sm:$0xff]  }
 0x142   :  { %2379 = vmatprep.subr.bf16.mxu1 %v4597_v11  ;;  %v4563_v11 = vld [vmem:[#allocation4 + $0x110] ss:$12 sps:$4 sm:$0xff]  }
 0x144   :  { %2347 = vmatpush2.bf16.msra.mxu0 %v4543_v2 }
 0x145   :  { %2348 = vmatprep.subr.bf16.mxu0 %v4548_v4  ;;  %2380 = vmatpush2.bf16.msra.mxu1 %v4595_v13  ;;  %v4568_v13 = vld [vmem:[#allocation4 + $0xf8] ss:$12 sps:$4 sm:$0xff]  }
 0x146   :  { %2381 = vmatprep.subr.bf16.mxu1 %v4600_v15  ;;  %v4573_v15 = vld [vmem:[#allocation4 + $0xe0] ss:$12 sps:$4 sm:$0xff]  }
 0x148   :  { %2349 = vmatpush2.bf16.msra.mxu0 %v4546_v6  ;;  %v4557_v6 = vld [vmem:[#allocation4 + $0x80] ss:$12 sps:$4 sm:$0xff]  }
 0x149   :  { %2350 = vmatprep.subr.bf16.mxu0 %v4551_v10  ;;  %2382 = vmatpush2.bf16.msra.mxu1 %v4598_v21  ;;  %v4562_v10 = vld [vmem:[#allocation4 + $0x68] ss:$12 sps:$4 sm:$0xff]  }
 0x14a   :  { %2383 = vmatprep.subr.bf16.mxu1 %v4603_v25  ;;  %v4582_v21 = vld [vmem:[#allocation4 + $0x8] ss:$12 sps:$4 sm:$0xff]  }
 0x14c   :  { %2351 = vmatpush2.bf16.msra.mxu0 %v4549_v12  ;;  %v4567_v12 = vld [vmem:[#allocation4 + $0x50] ss:$12 sps:$4 sm:$0xff]  }
 0x14d   :  { %4040 = vmatprep.subr.bf16.mxu0 %v4552_v14  ;;  %2384 = vmatpush2.bf16.msra.mxu1 %v4601_v24  ;;  %v4572_v14 = vld [vmem:[#allocation4 + $0x38] ss:$12 sps:$4 sm:$0xff]   ;;  %v332_v24 = vsub.s32 2, %v5059_v41 }
 0x14e   :  { %2385 = vmatprep.subr.bf16.mxu1 %v4606_v30 }
 0x14f   :  { %v1360_v17 = vpop.f32.mrf.mxu0 }
 0x150   :  { %v1401_v18 = vpop.f32.mrf.mxu1  ;;  %v1361_v45 = vadd.f32 %v1360_v17, %v325_v36  ;;  %v4577_v17 = vld [vmem:[#allocation4 + $0x20] ss:$12 sps:$4 sm:$0xff]   ;;  %v4634_v36 = vld [vmem:[#allocation6 + $0x74] ss:$8 sps:$4 sm:$0xff]  }
 0x151   :  { %v1362_v22 = vpop.f32.mrf.mxu0  ;;  %2386 = vmatpush2.bf16.msra.mxu1 %v4604_v32 }
 0x152   :  { %v1403_v23 = vpop.f32.mrf.mxu1  ;;  %2387 = vmatprep.subr.bf16.mxu1 %v4609_v34  ;;  %v1363_v46 = vadd.f32 %v1362_v22, %v329_v19  ;;  %v1402_v47 = vadd.f32 %v1401_v18, %v1361_v45  ;;  %v4578_v18 = vld [vmem:[#allocation4 + $0xc8] ss:$12 sps:$4 sm:$0xff]   ;;  %v4637_v45 = vld [vmem:[#allocation6 + $0x64] ss:$8 sps:$4 sm:$0xff]  }
 0x153   :  { %v1364_v27 = vpop.f32.mrf.mxu0 }
 0x154   :  { %v1405_v26 = vpop.f32.mrf.mxu1  ;;  %v1404_v49 = vadd.f32 %v1403_v23, %v1363_v46 }
 0x155   :  { %v1365_v29 = vpop.f32.mrf.mxu0  ;;  %2388 = vmatpush2.bf16.msra.mxu1 %v4607_v35  ;;  %v336_v26 = vsub.s32 3, %v5059_v41  ;;  %v4707_v41 = vld [vmem:[%s5221_s4 + $0x60] ss:$8 sps:$4 sm:$0xff]  }
 0x156   :  { %v1406_v28 = vpop.f32.mrf.mxu1  ;;  %2389 = vmatprep.subr.bf16.mxu1 %v4612_v38 }
 0x157   :  { %v333_v28 = vrot.slane %v5064_v43, %v332_v24  ;;  %v337_v30 = vrot.slane %v5064_v43, %v336_v26  ;;  %v4664_v26 = vld [vmem:[#allocation6 + $0xd4] ss:$8 sps:$4 sm:$0xff]  }
 0x158   :  { %v1483_v31 = vpop.f32.mrf.mxu1 }
 0x159   :  { %2390 = vmatpush2.bf16.msra.mxu1 %v4610_v52 }
 0x15a   :  { %v1485_v33 = vpop.f32.mrf.mxu1  ;;  %2391 = vmatprep.subr.bf16.mxu1 %v4615_v39 }
 0x15c   :  { %v1487_v9 = vpop.f32.mrf.mxu1 }
 0x15d   :  { %2392 = vmatpush2.bf16.msra.mxu1 %v4613_v40 }
 0x15e   :  { %v1488_v37 = vpop.f32.mrf.mxu1  ;;  %4062 = vmatprep.subr.bf16.mxu1 %v4616_v20 }
 0x18f   :  { %v1442_v48 = vpop.f32.mrf.mxu0 }
 0x190   :  { %v1443_v50 = vadd.f32 %v1442_v48, %v1402_v47  ;;  %v4635_v48 = vld [vmem:[#allocation6 + $0x60] ss:$8 sps:$4 sm:$0xff]  }
 0x191   :  { %v1444_v51 = vpop.f32.mrf.mxu0 }
 0x192   :  { %v1484_v53 = vadd.f32 %v1483_v31, %v1443_v50  ;;  %v1445_v54 = vadd.f32 %v1444_v51, %v1404_v49  ;;  %v4617_v51 = vld [vmem:[#allocation4 + $0x230] ss:$12 sps:$4 sm:$0xff]  }
 0x193   :  { %v1446_v55 = vpop.f32.mrf.mxu0 }
 0x194   :  { %v1486_v56 = vadd.f32 %v1485_v33, %v1445_v54  ;;  %v1654_v57 = vmax.f32 %v1484_v53, 0.0  ;;  %v4618_v54 = vld [vmem:[#allocation4 + $0x2d8] ss:$12 sps:$4 sm:$0xff]  }
 0x195   :  { %v1447_v58 = vpop.f32.mrf.mxu0  ;;  %v4619_v55 = vld [vmem:[#allocation4 + $0x218] ss:$12 sps:$4 sm:$0xff]  }
 0x196   :  { %v1655_v59 = vmax.f32 %v1486_v56, 0.0  ;;  %v1658_v63 = vpack.c.bf16 %v1654_v57, %v1654_v57  ;;  %v4620_v56 = vld [vmem:[#allocation4 + $0x2c0] ss:$12 sps:$4 sm:$0xff]   ;;  %v4622_v58 = vld [vmem:[#allocation4 + $0x2a8] ss:$12 sps:$4 sm:$0xff]  }
 0x197   :  { %v4621_v57 = vld [vmem:[#allocation4 + $0x200] ss:$12 sps:$4 sm:$0xff]  }
 0x198   :  { %v1524_v60 = vpop.f32.mrf.mxu1  ;;  %v1659_v61 = vpack.c.bf16 %v1655_v59, %v1655_v59  ;;  %v4623_v59 = vld [vmem:[#allocation4 + $0x1e8] ss:$12 sps:$4 sm:$0xff]  }
 0x199   :  { %v1525_v32 = vadd.f32 %v1524_v60, %v333_v28  ;;  %v4624_v60 = vld [vmem:[#allocation4 + $0x290] ss:$12 sps:$4 sm:$0xff]   ;;  %v4667_v28 = vld [vmem:[#allocation6 + $0xc4] ss:$8 sps:$4 sm:$0xff]  }
 0x19a   :  { %v1526_v0 = vpop.f32.mrf.mxu1  ;;  %2352 = vmatprep.mubr.bf16.mxu0 %v1659_v61 }
 0x19b   :  { %2353 = vmatmul.mubr.bf16.vlgmr.msra.gmra.mxu0 %v1658_v63  ;;  %v1527_v34 = vadd.f32 %v1526_v0, %v337_v30  ;;  %v4640_v0 = vld [vmem:[#allocation6 + $0x54] ss:$8 sps:$4 sm:$0xff]   ;;  %v4668_v30 = vld [vmem:[#allocation6 + $0xb0] ss:$8 sps:$4 sm:$0xff]  }
 0x19c   :  { %v1528_v2 = vpop.f32.mrf.mxu1  ;;  %4041 = vmatpush3.bf16.msra.mxu0 %v4553_v62  ;;  %2434 = vmatprep.mubr.bf16.mxu0 %v1659_v61  ;;  %v4625_v61 = vld [vmem:[#allocation4 + $0x1d0] ss:$12 sps:$4 sm:$0xff]   ;;  %v4626_v62 = vld [vmem:[#allocation4 + $0x278] ss:$12 sps:$4 sm:$0xff]  }
 0x19d   :  { %4042 = vmatprep.subr.bf16.mxu0 %v4554_v1  ;;  %v4628_v1 = vld [vmem:[#allocation4 + $0x260] ss:$12 sps:$4 sm:$0xff]   ;;  %v4638_v2 = vld [vmem:[#allocation6 + $0x50] ss:$8 sps:$4 sm:$0xff]  }
 0x19e   :  { %v1529_v4 = vpop.f32.mrf.mxu1 }
 0x19f   :  { %v4643_v4 = vld [vmem:[#allocation6 + $0x44] ss:$8 sps:$4 sm:$0xff]  }
 0x1a0   :  { %4043 = vmatpush3.bf16.msra.mxu0 %v4555_v3  ;;  %v4629_v3 = vld [vmem:[#allocation4 + $0x1a0] ss:$12 sps:$4 sm:$0xff]  }
 0x1a1   :  { %4044 = vmatprep.subr.bf16.mxu0 %v4556_v5  ;;  %v4630_v5 = vld [vmem:[#allocation4 + $0x248] ss:$12 sps:$4 sm:$0xff]  }
 0x1a4   :  { %4045 = vmatpush3.bf16.msra.mxu0 %v4557_v6  ;;  %v4641_v6 = vld [vmem:[#allocation6 + $0x40] ss:$8 sps:$4 sm:$0xff]  }
 0x1a5   :  { %4046 = vmatprep.subr.bf16.mxu0 %v4558_v7  ;;  %v4644_v7 = vld [vmem:[#allocation6 + $0x30] ss:$8 sps:$4 sm:$0xff]  }
 0x1a8   :  { %4047 = vmatpush3.bf16.msra.mxu0 %v4562_v10  ;;  %v4646_v10 = vld [vmem:[#allocation6 + $0x34] ss:$8 sps:$4 sm:$0xff]  }
 0x1a9   :  { %4048 = vmatprep.subr.bf16.mxu0 %v4563_v11  ;;  %v4631_v11 = vld [vmem:[#allocation4 + $0x188] ss:$12 sps:$4 sm:$0xff]  }
 0x1ac   :  { %4049 = vmatpush3.bf16.msra.mxu0 %v4567_v12  ;;  %v4649_v12 = vld [vmem:[#allocation6 + $0x24] ss:$8 sps:$4 sm:$0xff]  }
 0x1ad   :  { %4050 = vmatprep.subr.bf16.mxu0 %v4568_v13  ;;  %v4647_v13 = vld [vmem:[#allocation6 + $0x20] ss:$8 sps:$4 sm:$0xff]  }
 0x1b0   :  { %4051 = vmatpush3.bf16.msra.mxu0 %v4572_v14  ;;  %v4652_v14 = vld [vmem:[#allocation6 + $0x14] ss:$8 sps:$4 sm:$0xff]  }
 0x1b1   :  { %4052 = vmatprep.subr.bf16.mxu0 %v4573_v15  ;;  %v4650_v15 = vld [vmem:[#allocation6 + $0x10] ss:$8 sps:$4 sm:$0xff]  }
 0x1b4   :  { %4053 = vmatpush3.bf16.msra.mxu0 %v4577_v17  ;;  %v4655_v17 = vld [vmem:[#allocation6 + $0x4] ss:$8 sps:$4 sm:$0xff]  }
 0x1b5   :  { %4054 = vmatprep.subr.bf16.mxu0 %v4578_v18  ;;  %v4653_v18 = vld [vmem:[#allocation6] ss:$8 sps:$4 sm:$0xff]  }
 0x1b8   :  { %4055 = vmatpush3.bf16.msra.mxu0 %v4582_v21  ;;  %v4658_v21 = vld [vmem:[#allocation6 + $0xf4] ss:$8 sps:$4 sm:$0xff]  }
 0x1b9   :  { %2789 = vmatprep.subr.bf16.mxu0 %v4634_v36  ;;  %v4689_v36 = vld [vmem:[#allocation6 + $0x140] ss:$8 sps:$4 sm:$0xff]  }
 0x1bb   :  { %2435 = vmatmul.mubr.bf16.vlgmr.msra.gmra.mxu0 %v1658_v63  ;;  %v4627_v63 = vld [vmem:[#allocation4 + $0x1b8] ss:$12 sps:$4 sm:$0xff]  }
 0x1bc   :  { %2790 = vmatpush1.bf16.msra.mxu0 %v4632_v8  ;;  %v4691_v8 = vld [vmem:[#allocation6 + $0x144] ss:$8 sps:$4 sm:$0xff]  }
 0x1bd   :  { %2791 = vmatprep.subr.bf16.mxu0 %v4637_v45  ;;  %v4692_v45 = vld [vmem:[#allocation6 + $0x130] ss:$8 sps:$4 sm:$0xff]  }
 0x1c0   :  { %2792 = vmatpush1.bf16.msra.mxu0 %v4635_v48  ;;  %v4698_v48 = vld [vmem:[#allocation6 + $0x110] ss:$8 sps:$4 sm:$0xff]  }
 0x1c1   :  { %2793 = vmatprep.subr.bf16.mxu0 %v4640_v0 }
 0x1c4   :  { %2794 = vmatpush1.bf16.msra.mxu0 %v4638_v2 }
 0x1c5   :  { %2795 = vmatprep.subr.bf16.mxu0 %v4643_v4 }
 0x1c8   :  { %2796 = vmatpush1.bf16.msra.mxu0 %v4641_v6 }
 0x1c9   :  { %2797 = vmatprep.subr.bf16.mxu0 %v4646_v10 }
 0x1cc   :  { %2798 = vmatpush1.bf16.msra.mxu0 %v4644_v7 }
 0x1cd   :  { %2799 = vmatprep.subr.bf16.mxu0 %v4649_v12 }
 0x1cf   :  { %v1565_v22 = vpop.f32.mrf.mxu0 }
 0x1d0   :  { %v1566_v9 = vadd.f32 %v1565_v22, %v1525_v32  ;;  %2800 = vmatpush1.bf16.msra.mxu0 %v4647_v13  ;;  %v4656_v22 = vld [vmem:[#allocation6 + $0xf0] ss:$8 sps:$4 sm:$0xff]   ;;  %v4671_v32 = vld [vmem:[#allocation6 + $0xa0] ss:$8 sps:$4 sm:$0xff]  }
 0x1d1   :  { %v1567_v23 = vpop.f32.mrf.mxu0  ;;  %2801 = vmatprep.subr.bf16.mxu0 %v4652_v14 }
 0x1d2   :  { %v1568_v37 = vadd.f32 %v1567_v23, %v1527_v34  ;;  %v4661_v23 = vld [vmem:[#allocation6 + $0xe4] ss:$8 sps:$4 sm:$0xff]   ;;  %v4674_v34 = vld [vmem:[#allocation6 + $0x90] ss:$8 sps:$4 sm:$0xff]  }
 0x1d3   :  { %v1569_v25 = vpop.f32.mrf.mxu0 }
 0x1d4   :  { %2802 = vmatpush1.bf16.msra.mxu0 %v4650_v15  ;;  %v4659_v25 = vld [vmem:[#allocation6 + $0xe0] ss:$8 sps:$4 sm:$0xff]  }
 0x1d5   :  { %v1570_v27 = vpop.f32.mrf.mxu0  ;;  %2803 = vmatprep.subr.bf16.mxu0 %v4655_v17 }
 0x1d6   :  { %v4662_v27 = vld [vmem:[#allocation6 + $0xd0] ss:$8 sps:$4 sm:$0xff]  }
 0x1d8   :  { %v1606_v29 = vpop.f32.mrf.mxu1  ;;  %2804 = vmatpush1.bf16.msra.mxu0 %v4653_v18 }
 0x1d9   :  { %v1607_v38 = vadd.f32 %v1606_v29, %v1566_v9  ;;  %2805 = vmatprep.subr.bf16.mxu0 %v4658_v21  ;;  %v4665_v29 = vld [vmem:[#allocation6 + $0xc0] ss:$8 sps:$4 sm:$0xff]   ;;  %v4679_v9 = vld [vmem:[#allocation6 + $0x84] ss:$8 sps:$4 sm:$0xff]  }
 0x1da   :  { %v1608_v31 = vpop.f32.mrf.mxu1 }
 0x1db   :  { %v1609_v39 = vadd.f32 %v1608_v31, %v1568_v37  ;;  %v4673_v31 = vld [vmem:[#allocation6 + $0xa4] ss:$8 sps:$4 sm:$0xff]   ;;  %v4682_v37 = vld [vmem:[#allocation6 + $0x174] ss:$8 sps:$4 sm:$0xff]  }
 0x1dc   :  { %v1610_v33 = vpop.f32.mrf.mxu1  ;;  %2806 = vmatpush2.bf16.msra.mxu0 %v4656_v22 }
 0x1dd   :  { %2807 = vmatprep.subr.bf16.mxu0 %v4661_v23  ;;  %v4676_v33 = vld [vmem:[#allocation6 + $0x94] ss:$8 sps:$4 sm:$0xff]  }
 0x1de   :  { %v1611_v35 = vpop.f32.mrf.mxu1 }
 0x1df   :  { %v4677_v35 = vld [vmem:[#allocation6 + $0x80] ss:$8 sps:$4 sm:$0xff]  }
 0x1e0   :  { %v1647_v52 = vpop.f32.mrf.mxu1  ;;  %2808 = vmatpush2.bf16.msra.mxu0 %v4659_v25 }
 0x1e1   :  { %v1648_v40 = vadd.f32 %v1647_v52, %v1607_v38  ;;  %2809 = vmatprep.subr.bf16.mxu0 %v4664_v26  ;;  %v4680_v38 = vld [vmem:[#allocation6 + $0x170] ss:$8 sps:$4 sm:$0xff]   ;;  %v4685_v52 = vld [vmem:[#allocation6 + $0x164] ss:$8 sps:$4 sm:$0xff]  }
 0x1e2   :  { %v1649_v20 = vpop.f32.mrf.mxu1 }
 0x1e3   :  { %v1650_v19 = vadd.f32 %v1649_v20, %v1609_v39  ;;  %v1656_v46 = vmax.f32 %v1648_v40, 0.0  ;;  %v4683_v39 = vld [vmem:[#allocation6 + $0x160] ss:$8 sps:$4 sm:$0xff]   ;;  %v4688_v40 = vld [vmem:[#allocation6 + $0x154] ss:$8 sps:$4 sm:$0xff]  }
 0x1e4   :  { %v1651_v47 = vpop.f32.mrf.mxu1  ;;  %2810 = vmatpush2.bf16.msra.mxu0 %v4662_v27  ;;  %v4686_v20 = vld [vmem:[#allocation6 + $0x150] ss:$8 sps:$4 sm:$0xff]  }
 0x1e5   :  { %v1657_v43 = vmax.f32 %v1650_v19, 0.0  ;;  %v1660_v53 = vpack.c.bf16 %v1656_v46, %v1656_v46  ;;  %2811 = vmatprep.subr.bf16.mxu0 %v4667_v28  ;;  %v4694_v19 = vld [vmem:[#allocation6 + $0x134] ss:$8 sps:$4 sm:$0xff]   ;;  %v4697_v46 = vld [vmem:[#allocation6 + $0x124] ss:$8 sps:$4 sm:$0xff]  }
 0x1e6   :  { %v1652_v49 = vpop.f32.mrf.mxu1  ;;  %v4695_v47 = vld [vmem:[#allocation6 + $0x120] ss:$8 sps:$4 sm:$0xff]   ;;  %v4704_v28 = vld [vmem:[%s5221_s4 + $0x70] ss:$8 sps:$4 sm:$0xff]  }
 0x1e7   :  { %v1661_v50 = vpack.c.bf16 %v1657_v43, %v1657_v43  ;;  %v4700_v43 = vld [vmem:[#allocation6 + $0x114] ss:$8 sps:$4 sm:$0xff]   ;;  %v4703_v49 = vld [vmem:[#allocation6 + $0x104] ss:$8 sps:$4 sm:$0xff]  }
 0x1e8   :  { %2812 = vmatpush2.bf16.msra.mxu0 %v4665_v29 }
 0x1e9   :  { %2393 = vmatprep.mubr.bf16.mxu1 %v1661_v50 }
 0x1ea   :  { %2394 = vmatmul.mubr.bf16.vlgmr.msra.gmra.mxu1 %v1660_v53 }
 0x1eb   :  { %4063 = vmatpush3.bf16.msra.mxu1 %v4617_v51  ;;  %2474 = vmatprep.mubr.bf16.mxu1 %v1661_v50  ;;  %v4701_v50 = vld [vmem:[#allocation6 + $0x100] ss:$8 sps:$4 sm:$0xff]   ;;  %v4706_v51 = vld [vmem:[%s5221_s4 + $0x74] ss:$8 sps:$4 sm:$0xff]  }
 0x1ec   :  { %4064 = vmatprep.subr.bf16.mxu1 %v4618_v54 }
 0x1ef   :  { %4065 = vmatpush3.bf16.msra.mxu1 %v4619_v55 }
 0x1f0   :  { %4066 = vmatprep.subr.bf16.mxu1 %v4620_v56 }
 0x1f3   :  { %4067 = vmatpush3.bf16.msra.mxu1 %v4621_v57 }
 0x1f4   :  { %4068 = vmatprep.subr.bf16.mxu1 %v4622_v58 }
 0x1f7   :  { %4069 = vmatpush3.bf16.msra.mxu1 %v4623_v59 }
 0x1f8   :  { %4070 = vmatprep.subr.bf16.mxu1 %v4624_v60 }
 0x1fb   :  { %4071 = vmatpush3.bf16.msra.mxu1 %v4625_v61 }
 0x1fc   :  { %4072 = vmatprep.subr.bf16.mxu1 %v4626_v62  ;;  %v1791_v62 = vld [vmem:[#allocation10 + $0x1] ss:$8 sm:$0x7] }
 0x1fd   :  { %v1800_v0 = vrot.slane %v1791_v62, %v5067_v44  ;;  %v1804_v15 = vrot.slane %v1791_v62, %v332_v24  ;;  %v4712_v24 = vld [vmem:[%s5221_s4 + $0x54] ss:$8 sps:$4 sm:$0xff]  }
 0x1ff   :  { %4073 = vmatpush3.bf16.msra.mxu1 %v4627_v63  ;;  %v1796_v63 = vrot.slane %v1791_v62, %v5062_v42  ;;  %v4758_v62 = vld [vmem:[#allocation7 + $0x60] sm:$0xff]  }
 0x200   :  { %4074 = vmatprep.subr.bf16.mxu1 %v4628_v1 }
 0x203   :  { %4075 = vmatpush3.bf16.msra.mxu1 %v4629_v3 }
 0x204   :  { %4076 = vmatprep.subr.bf16.mxu1 %v4630_v5 }
 0x207   :  { %4077 = vmatpush3.bf16.msra.mxu1 %v4631_v11 }
 0x208   :  { %2830 = vmatprep.subr.bf16.mxu1 %v4682_v37  ;;  %v4724_v37 = vld [vmem:[%s5221_s4 + $0x14] ss:$8 sps:$4 sm:$0xff]  }
 0x20a   :  { %2475 = vmatmul.mubr.bf16.vlgmr.msra.gmra.mxu1 %v1660_v53 }
 0x20b   :  { %2862 = vmatprep.mubr.bf16.mxu1 %v4934_v16  ;;  %v4670_v16 = vld [vmem:[#allocation6 + $0xb4] ss:$8 sps:$4 sm:$0xff]   ;;  %2831 = vmatpush1.bf16.msra.mxu1 %v4680_v38  ;;  %v4722_v38 = vld [vmem:[%s5221_s4 + $0x10] ss:$8 sps:$4 sm:$0xff]  }
 0x20c   :  { %2813 = vmatprep.subr.bf16.mxu0 %v4670_v16  ;;  %2832 = vmatprep.subr.bf16.mxu1 %v4685_v52  ;;  %v4709_v16 = vld [vmem:[%s5221_s4 + $0x64] ss:$8 sps:$4 sm:$0xff]  }
 0x20d   :  { %2814 = vmatpush2.bf16.msra.mxu0 %v4668_v30  ;;  %v4710_v30 = vld [vmem:[%s5221_s4 + $0x50] ss:$8 sps:$4 sm:$0xff]   ;;  %v4727_v52 = vld [vmem:[%s5221_s4 + $0x4] ss:$8 sps:$4 sm:$0xff]  }
 0x20e   :  { %2815 = vmatprep.subr.bf16.mxu0 %v4673_v31  ;;  %v4715_v31 = vld [vmem:[%s5221_s4 + $0x44] ss:$8 sps:$4 sm:$0xff]  }
 0x20f   :  { %2833 = vmatpush1.bf16.msra.mxu1 %v4683_v39  ;;  %v4725_v39 = vld [vmem:[%s5221_s4] ss:$8 sps:$4 sm:$0xff]  }
 0x210   :  { %2834 = vmatprep.subr.bf16.mxu1 %v4688_v40  ;;  %v4730_v40 = vld [vmem:[%s5221_s4 + $0xf4] ss:$8 sps:$4 sm:$0xff]  }
 0x211   :  { %2816 = vmatpush2.bf16.msra.mxu0 %v4671_v32  ;;  %v4713_v32 = vld [vmem:[%s5221_s4 + $0x40] ss:$8 sps:$4 sm:$0xff]  }
 0x212   :  { %2817 = vmatprep.subr.bf16.mxu0 %v4676_v33  ;;  %v4718_v33 = vld [vmem:[%s5221_s4 + $0x34] ss:$8 sps:$4 sm:$0xff]  }
 0x213   :  { %2835 = vmatpush1.bf16.msra.mxu1 %v4686_v20  ;;  %v4728_v20 = vld [vmem:[%s5221_s4 + $0xf0] ss:$8 sps:$4 sm:$0xff]  }
 0x214   :  { %2836 = vmatprep.subr.bf16.mxu1 %v4691_v8  ;;  %v4733_v8 = vld [vmem:[%s5221_s4 + $0xe4] ss:$8 sps:$4 sm:$0xff]  }
 0x215   :  { %2818 = vmatpush2.bf16.msra.mxu0 %v4674_v34  ;;  %v4716_v34 = vld [vmem:[%s5221_s4 + $0x30] ss:$8 sps:$4 sm:$0xff]  }
 0x216   :  { %2819 = vmatprep.subr.bf16.mxu0 %v4679_v9  ;;  %v4721_v9 = vld [vmem:[%s5221_s4 + $0x24] ss:$8 sps:$4 sm:$0xff]  }
 0x217   :  { %2837 = vmatpush1.bf16.msra.mxu1 %v4689_v36  ;;  %v4731_v36 = vld [vmem:[%s5221_s4 + $0xe0] ss:$8 sps:$4 sm:$0xff]  }
 0x218   :  { %2838 = vmatprep.subr.bf16.mxu1 %v4694_v19  ;;  %v4736_v19 = vld [vmem:[%s5221_s4 + $0xd4] ss:$8 sps:$4 sm:$0xff]  }
 0x219   :  { %2820 = vmatpush2.bf16.msra.mxu0 %v4677_v35  ;;  %v4719_v35 = vld [vmem:[%s5221_s4 + $0x20] ss:$8 sps:$4 sm:$0xff]  }
 0x21b   :  { %2839 = vmatpush1.bf16.msra.mxu1 %v4692_v45  ;;  %v4734_v45 = vld [vmem:[%s5221_s4 + $0xd0] ss:$8 sps:$4 sm:$0xff]  }
 0x21c   :  { %2840 = vmatprep.subr.bf16.mxu1 %v4697_v46  ;;  %v4739_v46 = vld [vmem:[%s5221_s4 + $0xc4] ss:$8 sps:$4 sm:$0xff]  }
 0x21f   :  { %2841 = vmatpush1.bf16.msra.mxu1 %v4695_v47  ;;  %v4737_v47 = vld [vmem:[%s5221_s4 + $0xc0] ss:$8 sps:$4 sm:$0xff]  }
 0x220   :  { %2842 = vmatprep.subr.bf16.mxu1 %v4700_v43  ;;  %v4742_v43 = vld [vmem:[%s5221_s4 + $0xb4] ss:$8 sps:$4 sm:$0xff]  }
 0x223   :  { %2843 = vmatpush1.bf16.msra.mxu1 %v4698_v48  ;;  %v4740_v48 = vld [vmem:[%s5221_s4 + $0xb0] ss:$8 sps:$4 sm:$0xff]  }
 0x224   :  { %2844 = vmatprep.subr.bf16.mxu1 %v4703_v49  ;;  %v4745_v49 = vld [vmem:[%s5221_s4 + $0xa4] ss:$8 sps:$4 sm:$0xff]  }
 0x227   :  { %2845 = vmatpush1.bf16.msra.mxu1 %v4701_v50  ;;  %v4743_v50 = vld [vmem:[%s5221_s4 + $0xa0] ss:$8 sps:$4 sm:$0xff]  }
 0x228   :  { %3080 = vmatprep.subr.bf16.mxu1 %v4706_v51  ;;  %v4748_v51 = vld [vmem:[%s5221_s4 + $0x94] ss:$8 sps:$4 sm:$0xff]  }
 0x25b   :  { %v2354_v53 = vpop.f32.mrf.mxu0 }
 0x25c   :  { %v2355_v1 = vadd.f32 %v2354_v53, %v1796_v63  ;;  %v4746_v53 = vld [vmem:[%s5221_s4 + $0x90] ss:$8 sps:$4 sm:$0xff]   ;;  %v4759_v63 = vld [vmem:[#allocation7 + $0x20] sm:$0xff]  }
 0x25d   :  { %v2356_v54 = vpop.f32.mrf.mxu0 }
 0x25e   :  { %v2357_v3 = vadd.f32 %v2356_v54, %v1800_v0  ;;  %v4751_v54 = vld [vmem:[%s5221_s4 + $0x84] ss:$8 sps:$4 sm:$0xff]   ;;  %v4760_v0 = vld [vmem:[#allocation7 + $0x58] sm:$0xff]  }
 0x25f   :  { %v2358_v55 = vpop.f32.mrf.mxu0 }
 0x260   :  { %v4749_v55 = vld [vmem:[%s5221_s4 + $0x80] ss:$8 sps:$4 sm:$0xff]  }
 0x261   :  { %v2359_v56 = vpop.f32.mrf.mxu0 }
 0x262   :  { %v4752_v56 = vld [vmem:[#allocation7 + $0x78] sm:$0xff]  }
 0x263   :  { %4084 = vmatprep.subr.bf16.mxu0 %v4752_v56  ;;  %v3157_v56 = vld [vmem:[#allocation10 + $0x4] ss:$0 sm:$0xff] }
 0x27b   :  { %v4056_v57 = vpop.f32.mrf.mxu0 }
 0x27d   :  { %v4057_v58 = vpop.f32.mrf.mxu0 }
 0x27e   :  { %v4058_v59 = vadd.f32 %v4057_v58, %v4056_v57  ;;  %v4753_v57 = vld [vmem:[#allocation7 + $0x38] sm:$0xff]   ;;  %v4754_v58 = vld [vmem:[#allocation7 + $0x70] sm:$0xff]  }
 0x27f   :  { %v4059_v60 = vpop.f32.mrf.mxu0 }
 0x280   :  { %v2437_v21 = vadd.f32 %v4058_v59, %v1804_v15  ;;  %v4755_v59 = vld [vmem:[#allocation7 + $0x30] sm:$0xff]   ;;  %v4756_v60 = vld [vmem:[#allocation7 + $0x68] sm:$0xff]  }
 0x281   :  { %v4060_v61 = vpop.f32.mrf.mxu0 }
 0x282   :  { %v4757_v61 = vld [vmem:[#allocation7 + $0x28] sm:$0xff]  }
 0x2aa   :  { %v2395_v2 = vpop.f32.mrf.mxu1 }
 0x2ab   :  { %v2396_v4 = vadd.f32 %v2395_v2, %v2355_v1  ;;  %v4761_v1 = vld [vmem:[#allocation7 + $0x18] sm:$0xff]   ;;  %v4762_v2 = vld [vmem:[#allocation7 + $0x50] sm:$0xff]  }
 0x2ac   :  { %v2397_v5 = vpop.f32.mrf.mxu1 }
 0x2ad   :  { %v2398_v6 = vadd.f32 %v2397_v5, %v2357_v3  ;;  %v2482_v7 = vmax.f32 %v2396_v4, 0.0  ;;  %v4763_v3 = vld [vmem:[#allocation7 + $0x10] sm:$0xff]  }
 0x2ae   :  { %v2399_v10 = vpop.f32.mrf.mxu1 }
 0x2af   :  { %v2483_v11 = vmax.f32 %v2398_v6, 0.0  ;;  %v2485_v14 = vpack.c.bf16 %v2482_v7, %v2482_v7  ;;  %v2537_v10 = vld [vmem:[#allocation10 + $0x2] ss:$8 sm:$0x3] }
 0x2b0   :  { %v2400_v12 = vpop.f32.mrf.mxu1 }
 0x2b1   :  { %v2486_v13 = vpack.c.bf16 %v2483_v11, %v2483_v11  ;;  %v2542_v11 = vrot.slane %v2537_v10, %v5062_v42  ;;  %v2546_v12 = vrot.slane %v2537_v10, %v5067_v44  ;;  %v3312_v10 = vld [vmem:[#allocation10 + $0x5] ss:$0 sm:$0xff] }
 0x2b3   :  { %2821 = vmatprep.mubr.bf16.mxu0 %v2486_v13 }
 0x2b4   :  { %2822 = vmatmul.mubr.bf16.vlgmr.msra.gmra.mxu0 %v2485_v14 }
 0x2b5   :  { %4085 = vmatpush3.bf16.msra.mxu0 %v4753_v57 }
 0x2b6   :  { %4086 = vmatprep.subr.bf16.mxu0 %v4754_v58 }
 0x2b9   :  { %4087 = vmatpush3.bf16.msra.mxu0 %v4755_v59 }
 0x2ba   :  { %4088 = vmatprep.subr.bf16.mxu0 %v4756_v60 }
 0x2bd   :  { %4089 = vmatpush3.bf16.msra.mxu0 %v4757_v61 }
 0x2be   :  { %4090 = vmatprep.subr.bf16.mxu0 %v4758_v62 }
 0x2c1   :  { %4091 = vmatpush3.bf16.msra.mxu0 %v4759_v63 }
 0x2c2   :  { %4092 = vmatprep.subr.bf16.mxu0 %v4760_v0  ;;  %v4782_v0 = vld [vmem:[#allocation9 + $0x48] sm:$0xff]  }
 0x2c5   :  { %4093 = vmatpush3.bf16.msra.mxu0 %v4761_v1  ;;  %v4783_v1 = vld [vmem:[#allocation9 + $0x40] sm:$0xff]  }
 0x2c6   :  { %4094 = vmatprep.subr.bf16.mxu0 %v4762_v2  ;;  %v4784_v2 = vld [vmem:[#allocation9 + $0xb8] sm:$0xff]  }
 0x2c9   :  { %4095 = vmatpush3.bf16.msra.mxu0 %v4763_v3  ;;  %v4785_v3 = vld [vmem:[#allocation9 + $0xb0] sm:$0xff]  }
 0x2ca   :  { %v4078_v17 = vpop.f32.mrf.mxu1 }
 0x2cc   :  { %v4079_v18 = vpop.f32.mrf.mxu1 }
 0x2cd   :  { %v4080_v22 = vadd.f32 %v4079_v18, %v4078_v17 }
 0x2ce   :  { %v4081_v23 = vpop.f32.mrf.mxu1 }
 0x2cf   :  { %v2477_v25 = vadd.f32 %v4080_v22, %v2437_v21 }
 0x2d0   :  { %v4082_v26 = vpop.f32.mrf.mxu1 }
 0x2d1   :  { %v2484_v27 = vmax.f32 %v2477_v25, 0.0 }
 0x2d3   :  { %v2487_v29 = vpack.c.bf16 %v2484_v27, %v2484_v27 }
 0x2d5   :  { %2863 = vmatmul.mubr.bf16.vlgmr.msra.gmra.mxu1 %v2487_v29  ;;  %v4764_v29 = vld [vmem:[#allocation7 + $0x48] sm:$0xff]  }
 0x2d6   :  { %3081 = vmatpush1.bf16.msra.mxu1 %v4704_v28  ;;  %4096 = vmatprep.subr.bf16.mxu0 %v4764_v29 }
 0x2d7   :  { %3082 = vmatprep.subr.bf16.mxu1 %v4709_v16  ;;  %v4765_v16 = vld [vmem:[#allocation7 + $0x8] sm:$0xff]  }
 0x2d8   :  { %4097 = vmatpush3.bf16.msra.mxu0 %v4765_v16 }
 0x2da   :  { %3083 = vmatpush1.bf16.msra.mxu1 %v4707_v41  ;;  %v4766_v41 = vld [vmem:[#allocation7 + $0x40] sm:$0xff]  }
 0x2db   :  { %3084 = vmatprep.subr.bf16.mxu1 %v4712_v24  ;;  %v4767_v24 = vld [vmem:[#allocation7] sm:$0xff]   ;;  %4098 = vmatprep.subr.bf16.mxu0 %v4766_v41 }
 0x2dc   :  { %4099 = vmatpush3.bf16.msra.mxu0 %v4767_v24  ;;  %v3528_v24 = vld [vmem:[#allocation10 + $0x7] ss:$0 sm:$0xff] }
 0x2de   :  { %3085 = vmatpush1.bf16.msra.mxu1 %v4710_v30  ;;  %v4935_v30 = vmov 0.0  }
 0x2df   :  { %3086 = vmatprep.subr.bf16.mxu1 %v4715_v31  ;;  %4133 = vmatprep.subr.bf16.mxu0 %v4935_v30  ;;  %v2908_v31 = vld [vmem:[#allocation10 + $0x3] ss:$8 sm:$0x3] }
 0x2e2   :  { %3087 = vmatpush1.bf16.msra.mxu1 %v4713_v32  ;;  %v2913_v32 = vrot.slane %v2908_v31, %v5062_v42  ;;  %v4770_v42 = vld [vmem:[#allocation9 + $0x28] sm:$0xff]  }
 0x2e3   :  { %3088 = vmatprep.subr.bf16.mxu1 %v4718_v33  ;;  %v2917_v33 = vrot.slane %v2908_v31, %v5067_v44  ;;  %v4771_v44 = vld [vmem:[#allocation9 + $0x20] sm:$0xff]  }
 0x2e6   :  { %3089 = vmatpush1.bf16.msra.mxu1 %v4716_v34 }
 0x2e7   :  { %3090 = vmatprep.subr.bf16.mxu1 %v4721_v9 }
 0x2ea   :  { %3091 = vmatpush1.bf16.msra.mxu1 %v4719_v35 }
 0x2eb   :  { %3092 = vmatprep.subr.bf16.mxu1 %v4724_v37 }
 0x2ee   :  { %3093 = vmatpush1.bf16.msra.mxu1 %v4722_v38 }
 0x2ef   :  { %3094 = vmatprep.subr.bf16.mxu1 %v4727_v52 }
 0x2f2   :  { %3095 = vmatpush1.bf16.msra.mxu1 %v4725_v39 }
 0x2f3   :  { %3096 = vmatprep.subr.bf16.mxu1 %v4730_v40 }
 0x2f6   :  { %3097 = vmatpush2.bf16.msra.mxu1 %v4728_v20 }
 0x2f7   :  { %3098 = vmatprep.subr.bf16.mxu1 %v4733_v8  ;;  %v4768_v8 = vld [vmem:[#allocation9 + $0x38] sm:$0xff]  }
 0x2fa   :  { %3099 = vmatpush2.bf16.msra.mxu1 %v4731_v36 }
 0x2fb   :  { %3100 = vmatprep.subr.bf16.mxu1 %v4736_v19  ;;  %v4769_v19 = vld [vmem:[#allocation9 + $0x30] sm:$0xff]  }
 0x2fe   :  { %3101 = vmatpush2.bf16.msra.mxu1 %v4734_v45  ;;  %v4772_v45 = vld [vmem:[#allocation9 + $0x18] sm:$0xff]  }
 0x2ff   :  { %3102 = vmatprep.subr.bf16.mxu1 %v4739_v46  ;;  %v4773_v46 = vld [vmem:[#allocation9 + $0x10] sm:$0xff]  }
 0x302   :  { %3103 = vmatpush2.bf16.msra.mxu1 %v4737_v47  ;;  %v4774_v47 = vld [vmem:[#allocation9 + $0x8] sm:$0xff]  }
 0x303   :  { %3104 = vmatprep.subr.bf16.mxu1 %v4742_v43  ;;  %v4775_v43 = vld [vmem:[#allocation9] sm:$0xff]  }
 0x306   :  { %3105 = vmatpush2.bf16.msra.mxu1 %v4740_v48  ;;  %v4776_v48 = vld [vmem:[#allocation9 + $0x78] sm:$0xff]  }
 0x307   :  { %3106 = vmatprep.subr.bf16.mxu1 %v4745_v49  ;;  %v4777_v49 = vld [vmem:[#allocation9 + $0x70] sm:$0xff]  }
 0x30a   :  { %3107 = vmatpush2.bf16.msra.mxu1 %v4743_v50  ;;  %v4778_v50 = vld [vmem:[#allocation9 + $0x68] sm:$0xff]  }
 0x30b   :  { %3108 = vmatprep.subr.bf16.mxu1 %v4748_v51  ;;  %v4779_v51 = vld [vmem:[#allocation9 + $0x60] sm:$0xff]  }
 0x30e   :  { %3109 = vmatpush2.bf16.msra.mxu1 %v4746_v53  ;;  %v4780_v53 = vld [vmem:[#allocation9 + $0x58] sm:$0xff]  }
 0x30f   :  { %3110 = vmatprep.subr.bf16.mxu1 %v4751_v54  ;;  %v4781_v54 = vld [vmem:[#allocation9 + $0x50] sm:$0xff]  }
 0x312   :  { %3111 = vmatpush2.bf16.msra.mxu1 %v4749_v55 }
 0x313   :  { %4153 = vmatprep.subr.bf16.mxu1 %v4935_v30 }
 0x374   :  { %v2823_v4 = vpop.f32.mrf.mxu0 }
 0x375   :  { %v2824_v13 = vadd.f32 %v2823_v4, %v2542_v11  ;;  %v4786_v4 = vld [vmem:[#allocation9 + $0xa8] sm:$0xff]  }
 0x376   :  { %v2825_v5 = vpop.f32.mrf.mxu0 }
 0x377   :  { %v2826_v15 = vadd.f32 %v2825_v5, %v2546_v12  ;;  %v4787_v5 = vld [vmem:[#allocation9 + $0xa0] sm:$0xff]  }
 0x378   :  { %v2827_v6 = vpop.f32.mrf.mxu0 }
 0x379   :  { %v4788_v6 = vld [vmem:[#allocation9 + $0x98] sm:$0xff]  }
 0x37a   :  { %v2828_v7 = vpop.f32.mrf.mxu0 }
 0x37b   :  { %v4789_v7 = vld [vmem:[#allocation9 + $0x90] sm:$0xff]  }
 0x395   :  { %v2864_v14 = vpop.f32.mrf.mxu1 }
 0x396   :  { %v2865_v17 = vadd.f32 %v2864_v14, %v2824_v13 }
 0x397   :  { %v2866_v18 = vpop.f32.mrf.mxu1 }
 0x398   :  { %v2867_v21 = vadd.f32 %v2866_v18, %v2826_v15  ;;  %v2871_v22 = vmax.f32 %v2865_v17, 0.0 }
 0x399   :  { %v2868_v23 = vpop.f32.mrf.mxu1 }
 0x39a   :  { %v2872_v25 = vmax.f32 %v2867_v21, 0.0  ;;  %v2873_v28 = vpack.c.bf16 %v2871_v22, %v2871_v22  ;;  %v4790_v21 = vld [vmem:[#allocation9 + $0x88] sm:$0xff]   ;;  %v4791_v22 = vld [vmem:[#allocation9 + $0x80] sm:$0xff]  }
 0x39b   :  { %v2869_v26 = vpop.f32.mrf.mxu1  ;;  %v3420_v23 = vld [vmem:[#allocation10 + $0x6] ss:$0 sm:$0xff] }
 0x39c   :  { %v2874_v27 = vpack.c.bf16 %v2872_v25, %v2872_v25 }
 0x39e   :  { %3112 = vmatprep.mubr.bf16.mxu1 %v2874_v27 }
 0x39f   :  { %3113 = vmatmul.mubr.bf16.vlgmr.msra.gmra.mxu1 %v2873_v28 }
 0x3a0   :  { %4169 = vmatprep.mubr.msk.bf16.mxu1 %vm4936_vm1, %v4935_v30  ;;  %4154 = vmatpush3.bf16.msra.mxu1 %v4776_v48 }
 0x3a1   :  { %4155 = vmatprep.subr.bf16.mxu1 %v4935_v30 }
 0x3a4   :  { %4156 = vmatpush3.bf16.msra.mxu1 %v4777_v49 }
 0x3a5   :  { %4157 = vmatprep.subr.bf16.mxu1 %v4935_v30 }
 0x3a8   :  { %4158 = vmatpush3.bf16.msra.mxu1 %v4778_v50 }
 0x3a9   :  { %4159 = vmatprep.subr.bf16.mxu1 %v4935_v30 }
 0x3ac   :  { %4160 = vmatpush3.bf16.msra.mxu1 %v4779_v51 }
 0x3ad   :  { %4161 = vmatprep.subr.bf16.mxu1 %v4935_v30 }
 0x3b0   :  { %4162 = vmatpush3.bf16.msra.mxu1 %v4780_v53 }
 0x3b1   :  { %4163 = vmatprep.subr.bf16.mxu1 %v4935_v30 }
 0x3b4   :  { %4164 = vmatpush3.bf16.msra.mxu1 %v4781_v54 }
 0x3b5   :  { %4165 = vmatprep.subr.bf16.mxu1 %v4935_v30 }
 0x3b8   :  { %4166 = vmatpush3.bf16.msra.mxu1 %v4782_v0 }
 0x3b9   :  { %4167 = vmatprep.subr.bf16.mxu1 %v4935_v30 }
 0x3bc   :  { %4168 = vmatpush3.bf16.msra.mxu1 %v4783_v1 }
 0x45f   :  { %v3114_v34 = vpop.f32.mrf.mxu1 }
 0x460   :  { %v3115_v9 = vadd.f32 %v3114_v34, %v2913_v32 }
 0x461   :  { %v3116_v35 = vpop.f32.mrf.mxu1 }
 0x462   :  { %v3117_v37 = vadd.f32 %v3116_v35, %v2917_v33  ;;  %v3121_v38 = vmax.f32 %v3115_v9, 0.0 }
 0x463   :  { %v3118_v52 = vpop.f32.mrf.mxu1 }
 0x464   :  { %v3122_v39 = vmax.f32 %v3117_v37, 0.0  ;;  %v3123_v36 = vpack.c.bf16 %v3121_v38, %v3121_v38 }
 0x465   :  { %v3119_v40 = vpop.f32.mrf.mxu1 }
 0x466   :  { %v3124_v20 = vpack.c.bf16 %v3122_v39, %v3122_v39 }
 0x468   :  { %3286 = vmatprep.mubr.bf16.mxu0 %v3124_v20 }
 0x469   :  { %3287 = vmatmul.mubr.bf16.vlgmr.msra.gmra.mxu0 %v3123_v36 }
 0x46a   :  { %4134 = vmatpush3.bf16.msra.mxu0 %v4768_v8  ;;  %4149 = vmatprep.mubr.msk.bf16.mxu0 %vm4936_vm1, %v4935_v30 }
 0x46b   :  { %4135 = vmatprep.subr.bf16.mxu0 %v4935_v30 }
 0x46e   :  { %4136 = vmatpush3.bf16.msra.mxu0 %v4769_v19 }
 0x46f   :  { %4137 = vmatprep.subr.bf16.mxu0 %v4935_v30 }
 0x472   :  { %4138 = vmatpush3.bf16.msra.mxu0 %v4770_v42 }
 0x473   :  { %4139 = vmatprep.subr.bf16.mxu0 %v4935_v30 }
 0x476   :  { %4140 = vmatpush3.bf16.msra.mxu0 %v4771_v44 }
 0x477   :  { %4141 = vmatprep.subr.bf16.mxu0 %v4935_v30 }
 0x47a   :  { %4142 = vmatpush3.bf16.msra.mxu0 %v4772_v45 }
 0x47b   :  { %4143 = vmatprep.subr.bf16.mxu0 %v4935_v30 }
 0x47e   :  { %4144 = vmatpush3.bf16.msra.mxu0 %v4773_v46 }
 0x47f   :  { %4145 = vmatprep.subr.bf16.mxu0 %v4935_v30 }
 0x482   :  { %4146 = vmatpush3.bf16.msra.mxu0 %v4774_v47 }
 0x483   :  { %4147 = vmatprep.subr.bf16.mxu0 %v4935_v30 }
 0x486   :  { %4148 = vmatpush3.bf16.msra.mxu0 %v4775_v43 }
 0x487   :  { %4173 = vmatprep.subr.bf16.mxu0 %v4935_v30 }
 0x529   :  { %v4100_v55 = vpop.f32.mrf.mxu0 }
 0x52b   :  { %v4101_v57 = vpop.f32.mrf.mxu0 }
 0x52c   :  { %v4102_v58 = vadd.f32 %v4101_v57, %v4100_v55 }
 0x52d   :  { %v4103_v59 = vpop.f32.mrf.mxu0 }
 0x52e   :  { %v3289_v60 = vadd.f32 %v4102_v58, %v3157_v56 }
 0x52f   :  { %v4104_v61 = vpop.f32.mrf.mxu0 }
 0x530   :  { %v3294_v62 = vmax.f32 %v3289_v60, 0.0 }
 0x532   :  { %v3295_v63 = vpack.c.bf16 %v3294_v62, %v3294_v62 }
 0x534   :  { %4150 = vmatmul.mubr.bf16.vlgmr.msra.gmra.mxu0 %v3295_v63 }
 0x535   :  { %4189 = vmatprep.mubr.msk.bf16.mxu0 %vm4936_vm1, %v4935_v30  ;;  %4174 = vmatpush3.bf16.msra.mxu0 %v4784_v2 }
 0x536   :  { %4175 = vmatprep.subr.bf16.mxu0 %v4935_v30 }
 0x539   :  { %4176 = vmatpush3.bf16.msra.mxu0 %v4785_v3 }
 0x53a   :  { %4177 = vmatprep.subr.bf16.mxu0 %v4935_v30 }
 0x53d   :  { %4178 = vmatpush3.bf16.msra.mxu0 %v4786_v4 }
 0x53e   :  { %4179 = vmatprep.subr.bf16.mxu0 %v4935_v30 }
 0x541   :  { %4180 = vmatpush3.bf16.msra.mxu0 %v4787_v5 }
 0x542   :  { %4181 = vmatprep.subr.bf16.mxu0 %v4935_v30 }
 0x545   :  { %4182 = vmatpush3.bf16.msra.mxu0 %v4788_v6 }
 0x546   :  { %4183 = vmatprep.subr.bf16.mxu0 %v4935_v30 }
 0x549   :  { %4184 = vmatpush3.bf16.msra.mxu0 %v4789_v7 }
 0x54a   :  { %4185 = vmatprep.subr.bf16.mxu0 %v4935_v30 }
 0x54d   :  { %4186 = vmatpush3.bf16.msra.mxu0 %v4790_v21 }
 0x54e   :  { %4187 = vmatprep.subr.bf16.mxu0 %v4935_v30 }
 0x551   :  { %4188 = vmatpush3.bf16.msra.mxu0 %v4791_v22 }
 0x5f4   :  { %v3395_v11 = vpop.f32.mrf.mxu0 }
 0x5f5   :  { %v3396_v12 = vadd.f32 %v3395_v11, %v3312_v10 }
 0x5f6   :  { %v4151_v13 = vpop.f32.mrf.mxu0 }
 0x5f7   :  { %v3401_v14 = vmax.f32 %v3396_v12, 0.0 }
 0x5f8   :  { %v3398_v15 = vpop.f32.mrf.mxu0 }
 0x5f9   :  { %v3402_v17 = vpack.c.bf16 %v3401_v14, %v3401_v14 }
 0x5fa   :  { %v4152_v18 = vpop.f32.mrf.mxu0 }
 0x5fb   :  { %4170 = vmatmul.mubr.bf16.vlgmr.msra.gmra.mxu1 %v3402_v17 }
 0x6bb   :  { %v3503_v25 = vpop.f32.mrf.mxu1 }
 0x6bc   :  { %v3504_v26 = vadd.f32 %v3503_v25, %v3420_v23 }
 0x6bd   :  { %v4171_v27 = vpop.f32.mrf.mxu1 }
 0x6be   :  { %v3509_v28 = vmax.f32 %v3504_v26, 0.0 }
 0x6bf   :  { %v3506_v29 = vpop.f32.mrf.mxu1 }
 0x6c0   :  { %v3510_v16 = vpack.c.bf16 %v3509_v28, %v3509_v28 }
 0x6c1   :  { %v4172_v41 = vpop.f32.mrf.mxu1 }
 0x6c2   :  { %4190 = vmatmul.mubr.bf16.vlgmr.msra.gmra.mxu0 %v3510_v16 }
 0x782   :  { %v3611_v31 = vpop.f32.mrf.mxu0 }
 0x783   :  { %v3612_v32 = vadd.f32 %v3611_v31, %v3528_v24 }
 0x784   :  { %v4191_v33 = vpop.f32.mrf.mxu0 }
 0x785   :  { %3617 = vst [vmem:[%s5225_s8] sm:$0xff] %v3612_v32 }
 0x786   :  { %v3614_v30 = vpop.f32.mrf.mxu0 }
 0x788   :  { %v4192_v34 = vpop.f32.mrf.mxu0 }
 0x789   :  { %3622 = vsyncpa [#allocation3], 1 }
 0x78a   :  { %3623 = vsyncpa [#allocation5], 1 }
 0x78b   :  { %3624 = vsyncpa [#allocation8], 1 }
 0x78c   :  { %3625 = vsyncpa [#allocation11], 1 }

</bundles_post_ra>
